<compile_context>
chip_gen: v5e
topology: v5e:2x2
jax: 0.10.0
libtpu: 0.0.40
codegen_flags: <defaults>
</compile_context>

<pallas_src>
import math
import functools

import jax
import jax.numpy as jnp
from jax.experimental import pallas as pl
from jax.experimental.pallas import tpu as pltpu

_VMEM_LIMIT = 64 * 1024 * 1024  # fits v7x physical (64 MiB); well under v5e/v6e (128 MiB)


# ---------------------------------------------------------------------------
# in-kernel helpers
# ---------------------------------------------------------------------------
def _layer_norm(x, w, b, eps):
    mu = jnp.mean(x, axis=-1, keepdims=True)
    var = jnp.mean(jnp.square(x - mu), axis=-1, keepdims=True)
    return (x - mu) * jax.lax.rsqrt(var + eps) * w + b


def _gelu_exact(x):
    # torch nn.GELU() default (erf form), as used by torchvision's MLPBlock.
    return 0.5 * x * (1.0 + jax.lax.erf(x * (1.0 / math.sqrt(2.0))))


# ---------------------------------------------------------------------------
# kernels
# ---------------------------------------------------------------------------
def embed_kernel(p_ref, w_ref, b_ref, cls_ref, pos_ref, o_ref, *, n_patches):
    """Fused conv_proj (as matmul) + class token + positional embedding + pad rows.

    p_ref:   (1, Np, C*P*P) f32   patches of one image
    w_ref:   (C*P*P, D)     bf16  conv_proj weight (pre-transposed)
    b_ref:   (1, D)         f32   conv_proj bias
    cls_ref: (1, D)         f32   class token
    pos_ref: (S_pad, D)     f32   positional embedding, zero in padded rows
    o_ref:   (1, S_pad, D)  f32
    """
    s_pad, d = pos_ref.shape
    emb = jnp.dot(p_ref[0].astype(jnp.bfloat16), w_ref[...],
                  preferred_element_type=jnp.float32) + b_ref[...]        # (Np, D)
    rows = [cls_ref[...], emb]
    pad = s_pad - (n_patches + 1)
    if pad > 0:
        rows.append(jnp.zeros((pad, d), jnp.float32))
    # single lane-dense, sublane-contiguous store of the whole (S_pad, D) block
    o_ref[0] = jnp.concatenate(rows, axis=0) + pos_ref[...]


def encoder_block_kernel(x_ref, ln1w, ln1b, qkvw, qkvb, ow, ob,
                         ln2w, ln2b, f1w, f1b, f2w, f2b,
                         o_ref, ctx_sc, *, num_heads, seq_len):
    # x_ref block: (1, S_pad, D) f32 — one batch element per grid step.
    x = x_ref[0]                                    # (S_pad, D)
    s_pad, d = x.shape
    nh = num_heads
    dh = d // nh
    scale = 1.0 / math.sqrt(dh)

    # hoist parameter reads once (JAX does not CSE broadcast_in_dim)
    g1, beta1 = ln1w[...], ln1b[...]
    g2, beta2 = ln2w[...], ln2b[...]
    w_qkv, b_qkv = qkvw[...], qkvb[...]             # bf16, f32
    w_o, b_o = ow[...], ob[...]
    w_1, b_1 = f1w[...], f1b[...]
    w_2, b_2 = f2w[...], f2b[...]

    # --- pre-LN multi-head self-attention (eps=1e-6 like torchvision) ---
    h1 = _layer_norm(x, g1, beta1, 1e-6)
    qkv = jnp.dot(h1.astype(jnp.bfloat16), w_qkv,
                  preferred_element_type=jnp.float32) + b_qkv             # (S, 3D) f32

    def head_stack(base):                           # -> (nh, S_pad, dh)
        return jnp.concatenate(
            [qkv[None, :, base + h * dh: base + (h + 1) * dh] for h in range(nh)],
            axis=0)

    q = head_stack(0).astype(jnp.bfloat16)
    k = head_stack(d).astype(jnp.bfloat16)
    v = head_stack(2 * d).astype(jnp.bfloat16)

    # batched over heads: (nh,S,dh) x (nh,S,dh) -> (nh,S,S)
    scores = jax.lax.dot_general(q, k, (((2,), (2,)), ((0,), (0,))),
                                 preferred_element_type=jnp.float32) * scale
    if seq_len < s_pad:                             # mask padded key positions
        kid = jax.lax.broadcasted_iota(jnp.int32, scores.shape, 2)
        scores = jnp.where(kid < seq_len, scores, jnp.float32(-1e30))
    scores = scores - jnp.max(scores, axis=-1, keepdims=True)
    e = jnp.exp(scores)
    attn = e * pl.reciprocal(jnp.sum(e, axis=-1, keepdims=True), approx=True)

    # (nh,S,S) x (nh,S,dh) -> (nh,S,dh)
    ctx = jax.lax.dot_general(attn.astype(jnp.bfloat16), v,
                              (((2,), (1,)), ((0,), (0,))),
                              preferred_element_type=jnp.float32)
    # pack heads side by side into a contiguous (S,D) scratch -> one full-D out-proj
    for h in range(nh):
        ctx_sc[:, h * dh:(h + 1) * dh] = ctx[h]
    attn_out = jnp.dot(ctx_sc[...].astype(jnp.bfloat16), w_o,
                       preferred_element_type=jnp.float32) + b_o
    x = x + attn_out

    # --- MLP block (pre-LN, exact-erf GELU) ---
    h2 = _layer_norm(x, g2, beta2, 1e-6)
    m = jnp.dot(h2.astype(jnp.bfloat16), w_1,
                preferred_element_type=jnp.float32) + b_1
    m = _gelu_exact(m)
    m = jnp.dot(m.astype(jnp.bfloat16), w_2,
                preferred_element_type=jnp.float32) + b_2
    o_ref[0] = x + m


def head_kernel(x_ref, elnw, elnb, qlnw, qlnb, lw, lb, o_ref):
    # x_ref: (B, D) class tokens.  encoder.ln is per-token, so applying it to the class
    # token only is identical to applying it to the full sequence first.
    x = _layer_norm(x_ref[...], elnw[...], elnb[...], 1e-6)   # encoder.ln
    x = _layer_norm(x, qlnw[...], qlnb[...], 1e-5)            # self.q[0] (default eps)
    o_ref[...] = jnp.dot(x, lw[...], preferred_element_type=jnp.float32) + lb[...]


# ---------------------------------------------------------------------------
# params / wrapper
# ---------------------------------------------------------------------------
def init_params(key, *, out_dim, in_channels, imgsize, patch, num_layers,
                d_model, nhead, d_ff_ratio):
    del nhead
    P, D = patch, d_model
    mlp = d_model * d_ff_ratio
    Np = (imgsize // P) ** 2
    S = Np + 1
    keys = iter(jax.random.split(key, 8 + num_layers * 8))

    def w(shape, dtype=jnp.float32, scale=0.02):
        return (scale * jax.random.normal(next(keys), shape, jnp.float32)).astype(dtype)

    params = {
        "patch_w": w((in_channels * P * P, D), jnp.bfloat16),
        "patch_b": jnp.zeros((1, D), jnp.float32),
        "cls_token": w((1, D)),
        "pos_emb": w((S, D)),
        "enc_ln_w": jnp.ones((1, D), jnp.float32),
        "enc_ln_b": jnp.zeros((1, D), jnp.float32),
        "q_ln_w": jnp.ones((1, D), jnp.float32),
        "q_ln_b": jnp.zeros((1, D), jnp.float32),
        "q_lin_w": w((D, out_dim)),
        "q_lin_b": jnp.zeros((1, out_dim), jnp.float32),
        "layers": [],
    }
    for _ in range(num_layers):
        params["layers"].append(dict(
            ln1_w=jnp.ones((1, D), jnp.float32), ln1_b=jnp.zeros((1, D), jnp.float32),
            qkv_w=w((D, 3 * D), jnp.bfloat16), qkv_b=jnp.zeros((1, 3 * D), jnp.float32),
            out_w=w((D, D), jnp.bfloat16), out_b=jnp.zeros((1, D), jnp.float32),
            ln2_w=jnp.ones((1, D), jnp.float32), ln2_b=jnp.zeros((1, D), jnp.float32),
            fc1_w=w((D, mlp), jnp.bfloat16), fc1_b=jnp.zeros((1, mlp), jnp.float32),
            fc2_w=w((mlp, D), jnp.bfloat16), fc2_b=jnp.zeros((1, D), jnp.float32),
        ))
    return params


def vit_forward(x, params, cfg):
    B, C, H, W = x.shape
    P, D = cfg["patch"], cfg["d_model"]
    nh = cfg["nhead"]
    mlp = D * cfg["d_ff_ratio"]
    nh_p, nw_p = H // P, W // P
    Np = nh_p * nw_p
    S = Np + 1
    S_pad = ((S + 7) // 8) * 8          # sublane-aligned token count
    CPP = C * P * P

    # --- patchify (glue): NCHW -> (B, Np, C*P*P), row-major patch order like torchvision
    patches = (x.reshape(B, C, nh_p, P, nw_p, P)
                 .transpose(0, 2, 4, 1, 3, 5)
                 .reshape(B, Np, CPP)).astype(jnp.float32)

    # positional embedding padded with zero rows out to S_pad
    pos = jnp.zeros((S_pad, D), jnp.float32).at[:S, :].set(params["pos_emb"])

    # --- fused patch-embed + class token + positional add (grid over batch) ---
    seq = pl.pallas_call(
        functools.partial(embed_kernel, n_patches=Np),
        grid=(B,),
        out_shape=jax.ShapeDtypeStruct((B, S_pad, D), jnp.float32),
        in_specs=[
            pl.BlockSpec((1, Np, CPP), lambda b: (b, 0, 0)),
            pl.BlockSpec((CPP, D), lambda b: (0, 0)),
            pl.BlockSpec((1, D), lambda b: (0, 0)),
            pl.BlockSpec((1, D), lambda b: (0, 0)),
            pl.BlockSpec((S_pad, D), lambda b: (0, 0)),
        ],
        out_specs=pl.BlockSpec((1, S_pad, D), lambda b: (b, 0, 0)),
        compiler_params=pltpu.CompilerParams(
            dimension_semantics=("parallel",),
            vmem_limit_bytes=_VMEM_LIMIT),
    )(patches, params["patch_w"], params["patch_b"], params["cls_token"], pos)

    # --- transformer encoder blocks (fused per-layer kernel, grid over batch) ---
    block = functools.partial(encoder_block_kernel, num_heads=nh, seq_len=S)
    flops = 2 * B * S_pad * (3 * D * D + 2 * S_pad * D + D * D + 2 * D * mlp)
    transcendentals = B * S_pad * (nh * S_pad + mlp)
    bytes_accessed = (8 * B * S_pad * D                 # f32 activation in + out
                      + 2 * (4 * D * D + 2 * D * mlp)   # bf16 matmul weights
                      + 4 * (11 * D + mlp))             # f32 biases / LN params (approx)
    cost = pl.CostEstimate(flops=flops, transcendentals=transcendentals,
                           bytes_accessed=bytes_accessed)

    x_spec = pl.BlockSpec((1, S_pad, D), lambda b: (b, 0, 0))
    for lp in params["layers"]:
        weights = [lp["ln1_w"], lp["ln1_b"], lp["qkv_w"], lp["qkv_b"],
                   lp["out_w"], lp["out_b"], lp["ln2_w"], lp["ln2_b"],
                   lp["fc1_w"], lp["fc1_b"], lp["fc2_w"], lp["fc2_b"]]
        # NOTE: weight index_maps are grid-invariant (never re-DMAed across the batch
        # grid); on v7x they could additionally be single-buffered via
        # pipeline_mode=pl.Buffered(1) to further cut VMEM residency.
        in_specs = [x_spec] + [pl.BlockSpec(wt.shape, lambda b: (0, 0)) for wt in weights]
        seq = pl.pallas_call(
            block,
            grid=(B,),
            out_shape=jax.ShapeDtypeStruct((B, S_pad, D), jnp.float32),
            in_specs=in_specs,
            out_specs=x_spec,
            scratch_shapes=[pltpu.VMEM((S_pad, D), jnp.float32)],
            compiler_params=pltpu.CompilerParams(
                dimension_semantics=("parallel",),
                vmem_limit_bytes=_VMEM_LIMIT),
            cost_estimate=cost,
        )(seq, *weights)

    # --- encoder.ln + class-token select + heads(Identity) + q(LayerNorm, Linear) ---
    cls_tok = seq[:, 0, :]                                           # (B, D)
    out = pl.pallas_call(
        head_kernel,
        out_shape=jax.ShapeDtypeStruct((B, cfg["out_dim"]), jnp.float32),
        in_specs=[pl.BlockSpec(memory_space=pltpu.MemorySpace.VMEM)] * 7,
        out_specs=pl.BlockSpec(memory_space=pltpu.MemorySpace.VMEM),
    )(cls_tok, params["enc_ln_w"], params["enc_ln_b"],
      params["q_ln_w"], params["q_ln_b"], params["q_lin_w"], params["q_lin_b"])
    return out


if __name__ == "__main__":
    cfg = dict(out_dim=8, in_channels=4, imgsize=16, patch=4,
               num_layers=2, d_model=32, nhead=4, d_ff_ratio=2)
    key = jax.random.PRNGKey(0)
    kp, kx = jax.random.split(key)
    params = init_params(kp, **cfg)
    x = jax.random.normal(
        kx, (2, cfg["in_channels"], cfg["imgsize"], cfg["imgsize"]), jnp.float32)

    fwd = jax.jit(lambda xx, pp: vit_forward(xx, pp, cfg))
    out = jax.block_until_ready(fwd(x, params))
    assert out.shape == (2, cfg["out_dim"]), out.shape
    assert bool(jnp.all(jnp.isfinite(out)))
    print("KERNEL_OK")
</pallas_src>

<mosaic_0001>
module attributes {stable_mosaic.version = 11 : i64} {
  func.func @embed_kernel(%arg0: i32, %arg1: memref<1x16x64xf32, #tpu.memory_space<vmem>>, %arg2: memref<64x32xbf16, #tpu.memory_space<vmem>>, %arg3: memref<1x32xf32, #tpu.memory_space<vmem>>, %arg4: memref<1x32xf32, #tpu.memory_space<vmem>>, %arg5: memref<24x32xf32, #tpu.memory_space<vmem>>, %arg6: memref<1x24x32xf32, #tpu.memory_space<vmem>>) attributes {dimension_semantics = [#tpu.dimension_semantics<parallel>], iteration_bounds = array<i64: 2>, scalar_prefetch = 0 : i64, scratch_operands = 0 : i64, tpu.core_type = #tpu.core_type<tc>, window_params = [{transform_indices = @transform_0, window_bounds = array<i64: 1, 16, 64>}, {pipeline_mode = #tpu.pipeline_mode<synchronous>, transform_indices = @transform_1, window_bounds = array<i64: 64, 32>}, {pipeline_mode = #tpu.pipeline_mode<synchronous>, transform_indices = @transform_2, window_bounds = array<i64: 1, 32>}, {pipeline_mode = #tpu.pipeline_mode<synchronous>, transform_indices = @transform_3, window_bounds = array<i64: 1, 32>}, {pipeline_mode = #tpu.pipeline_mode<synchronous>, transform_indices = @transform_4, window_bounds = array<i64: 24, 32>}, {transform_indices = @transform_5, window_bounds = array<i64: 1, 24, 32>}]} {
    %c0 = arith.constant 0 : index
    %c0_0 = arith.constant 0 : index
    %c0_1 = arith.constant 0 : index
    %0 = vector.load %arg1[%c0, %c0_0, %c0_1] : memref<1x16x64xf32, #tpu.memory_space<vmem>>, vector<1x16x64xf32>
    %1 = vector.shape_cast %0 : vector<1x16x64xf32> to vector<16x64xf32>
    %2 = arith.truncf %1 : vector<16x64xf32> to vector<16x64xbf16>
    %c0_2 = arith.constant 0 : index
    %c0_3 = arith.constant 0 : index
    %3 = vector.load %arg2[%c0_2, %c0_3] : memref<64x32xbf16, #tpu.memory_space<vmem>>, vector<64x32xbf16>
    %cst = arith.constant dense<0.000000e+00> : vector<16x32xf32>
    %4 = tpu.matmul %2, %3, %cst {dimension_numbers = #tpu.dot_dimension_numbers<[1], [0], [0], [1], [0, 0, 1, 1], [], []>} : vector<16x64xbf16>, vector<64x32xbf16>, vector<16x32xf32> -> vector<16x32xf32>
    %c0_4 = arith.constant 0 : index
    %c0_5 = arith.constant 0 : index
    %5 = vector.load %arg3[%c0_4, %c0_5] : memref<1x32xf32, #tpu.memory_space<vmem>>, vector<1x32xf32>
    %6 = vector.broadcast %5 : vector<1x32xf32> to vector<16x32xf32>
    %7 = arith.addf %4, %6 : vector<16x32xf32>
    %c0_6 = arith.constant 0 : index
    %c0_7 = arith.constant 0 : index
    %8 = vector.load %arg4[%c0_6, %c0_7] : memref<1x32xf32, #tpu.memory_space<vmem>>, vector<1x32xf32>
    %cst_8 = arith.constant 0.000000e+00 : f32
    %9 = vector.broadcast %cst_8 : f32 to vector<7x32xf32>
    %10 = tpu.concatenate %8, %7, %9 in 0 : vector<1x32xf32>, vector<16x32xf32>, vector<7x32xf32> -> vector<24x32xf32>
    %c0_9 = arith.constant 0 : index
    %c0_10 = arith.constant 0 : index
    %11 = vector.load %arg5[%c0_9, %c0_10] : memref<24x32xf32, #tpu.memory_space<vmem>>, vector<24x32xf32>
    %12 = arith.addf %10, %11 : vector<24x32xf32>
    %c0_11 = arith.constant 0 : index
    %c0_12 = arith.constant 0 : index
    %c0_13 = arith.constant 0 : index
    %13 = vector.load %arg6[%c0_11, %c0_12, %c0_13] : memref<1x24x32xf32, #tpu.memory_space<vmem>>, vector<1x24x32xf32>
    %14 = vector.shape_cast %13 : vector<1x24x32xf32> to vector<24x32xf32>
    %15 = vector.shape_cast %12 : vector<24x32xf32> to vector<1x24x32xf32>
    tpu.vector_store %arg6[%c0_11, %c0_12, %c0_13], %15 {strides = array<i32>} : memref<1x24x32xf32, #tpu.memory_space<vmem>>, vector<1x24x32xf32>,
    return
  }
  func.func @transform_0(%arg0: i32) -> (i32, i32, i32) {
    %c0_i32 = arith.constant 0 : i32
    %c0_i32_0 = arith.constant 0 : i32
    %c0_i32_1 = arith.constant 0 : i32
    return %arg0, %c0_i32, %c0_i32_0 : i32, i32, i32
  }
  func.func @transform_1(%arg0: i32) -> (i32, i32) {
    %c0_i32 = arith.constant 0 : i32
    %c0_i32_0 = arith.constant 0 : i32
    %c0_i32_1 = arith.constant 0 : i32
    return %c0_i32, %c0_i32_0 : i32, i32
  }
  func.func @transform_2(%arg0: i32) -> (i32, i32) {
    %c0_i32 = arith.constant 0 : i32
    %c0_i32_0 = arith.constant 0 : i32
    %c0_i32_1 = arith.constant 0 : i32
    return %c0_i32, %c0_i32_0 : i32, i32
  }
  func.func @transform_3(%arg0: i32) -> (i32, i32) {
    %c0_i32 = arith.constant 0 : i32
    %c0_i32_0 = arith.constant 0 : i32
    %c0_i32_1 = arith.constant 0 : i32
    return %c0_i32, %c0_i32_0 : i32, i32
  }
  func.func @transform_4(%arg0: i32) -> (i32, i32) {
    %c0_i32 = arith.constant 0 : i32
    %c0_i32_0 = arith.constant 0 : i32
    %c0_i32_1 = arith.constant 0 : i32
    return %c0_i32, %c0_i32_0 : i32, i32
  }
  func.func @transform_5(%arg0: i32) -> (i32, i32, i32) {
    %c0_i32 = arith.constant 0 : i32
    %c0_i32_0 = arith.constant 0 : i32
    %c0_i32_1 = arith.constant 0 : i32
    return %arg0, %c0_i32, %c0_i32_0 : i32, i32, i32
  }
}

module attributes {stable_mosaic.version = 11 : i64} {
  func.func @encoder_block_kernel(%arg0: i32, %arg1: memref<1x24x32xf32, #tpu.memory_space<vmem>>, %arg2: memref<1x32xf32, #tpu.memory_space<vmem>>, %arg3: memref<1x32xf32, #tpu.memory_space<vmem>>, %arg4: memref<32x96xbf16, #tpu.memory_space<vmem>>, %arg5: memref<1x96xf32, #tpu.memory_space<vmem>>, %arg6: memref<32x32xbf16, #tpu.memory_space<vmem>>, %arg7: memref<1x32xf32, #tpu.memory_space<vmem>>, %arg8: memref<1x32xf32, #tpu.memory_space<vmem>>, %arg9: memref<1x32xf32, #tpu.memory_space<vmem>>, %arg10: memref<32x64xbf16, #tpu.memory_space<vmem>>, %arg11: memref<1x64xf32, #tpu.memory_space<vmem>>, %arg12: memref<64x32xbf16, #tpu.memory_space<vmem>>, %arg13: memref<1x32xf32, #tpu.memory_space<vmem>>, %arg14: memref<1x24x32xf32, #tpu.memory_space<vmem>>, %arg15: memref<24x32xf32, #tpu.memory_space<vmem>>) attributes {dimension_semantics = [#tpu.dimension_semantics<parallel>], iteration_bounds = array<i64: 2>, scalar_prefetch = 0 : i64, scratch_operands = 1 : i64, tpu.core_type = #tpu.core_type<tc>, window_params = [{transform_indices = @transform_0, window_bounds = array<i64: 1, 24, 32>}, {pipeline_mode = #tpu.pipeline_mode<synchronous>, transform_indices = @transform_1, window_bounds = array<i64: 1, 32>}, {pipeline_mode = #tpu.pipeline_mode<synchronous>, transform_indices = @transform_2, window_bounds = array<i64: 1, 32>}, {pipeline_mode = #tpu.pipeline_mode<synchronous>, transform_indices = @transform_3, window_bounds = array<i64: 32, 96>}, {pipeline_mode = #tpu.pipeline_mode<synchronous>, transform_indices = @transform_4, window_bounds = array<i64: 1, 96>}, {pipeline_mode = #tpu.pipeline_mode<synchronous>, transform_indices = @transform_5, window_bounds = array<i64: 32, 32>}, {pipeline_mode = #tpu.pipeline_mode<synchronous>, transform_indices = @transform_6, window_bounds = array<i64: 1, 32>}, {pipeline_mode = #tpu.pipeline_mode<synchronous>, transform_indices = @transform_7, window_bounds = array<i64: 1, 32>}, {pipeline_mode = #tpu.pipeline_mode<synchronous>, transform_indices = @transform_8, window_bounds = array<i64: 1, 32>}, {pipeline_mode = #tpu.pipeline_mode<synchronous>, transform_indices = @transform_9, window_bounds = array<i64: 32, 64>}, {pipeline_mode = #tpu.pipeline_mode<synchronous>, transform_indices = @transform_10, window_bounds = array<i64: 1, 64>}, {pipeline_mode = #tpu.pipeline_mode<synchronous>, transform_indices = @transform_11, window_bounds = array<i64: 64, 32>}, {pipeline_mode = #tpu.pipeline_mode<synchronous>, transform_indices = @transform_12, window_bounds = array<i64: 1, 32>}, {transform_indices = @transform_13, window_bounds = array<i64: 1, 24, 32>}]} {
    %c0 = arith.constant 0 : index
    %c0_0 = arith.constant 0 : index
    %c0_1 = arith.constant 0 : index
    %0 = vector.load %arg1[%c0, %c0_0, %c0_1] : memref<1x24x32xf32, #tpu.memory_space<vmem>>, vector<1x24x32xf32>
    %1 = vector.shape_cast %0 : vector<1x24x32xf32> to vector<24x32xf32>
    %c0_2 = arith.constant 0 : index
    %c0_3 = arith.constant 0 : index
    %2 = vector.load %arg2[%c0_2, %c0_3] : memref<1x32xf32, #tpu.memory_space<vmem>>, vector<1x32xf32>
    %c0_4 = arith.constant 0 : index
    %c0_5 = arith.constant 0 : index
    %3 = vector.load %arg3[%c0_4, %c0_5] : memref<1x32xf32, #tpu.memory_space<vmem>>, vector<1x32xf32>
    %c0_6 = arith.constant 0 : index
    %c0_7 = arith.constant 0 : index
    %4 = vector.load %arg8[%c0_6, %c0_7] : memref<1x32xf32, #tpu.memory_space<vmem>>, vector<1x32xf32>
    %c0_8 = arith.constant 0 : index
    %c0_9 = arith.constant 0 : index
    %5 = vector.load %arg9[%c0_8, %c0_9] : memref<1x32xf32, #tpu.memory_space<vmem>>, vector<1x32xf32>
    %c0_10 = arith.constant 0 : index
    %c0_11 = arith.constant 0 : index
    %6 = vector.load %arg4[%c0_10, %c0_11] : memref<32x96xbf16, #tpu.memory_space<vmem>>, vector<32x96xbf16>
    %c0_12 = arith.constant 0 : index
    %c0_13 = arith.constant 0 : index
    %7 = vector.load %arg5[%c0_12, %c0_13] : memref<1x96xf32, #tpu.memory_space<vmem>>, vector<1x96xf32>
    %c0_14 = arith.constant 0 : index
    %c0_15 = arith.constant 0 : index
    %8 = vector.load %arg6[%c0_14, %c0_15] : memref<32x32xbf16, #tpu.memory_space<vmem>>, vector<32x32xbf16>
    %c0_16 = arith.constant 0 : index
    %c0_17 = arith.constant 0 : index
    %9 = vector.load %arg7[%c0_16, %c0_17] : memref<1x32xf32, #tpu.memory_space<vmem>>, vector<1x32xf32>
    %c0_18 = arith.constant 0 : index
    %c0_19 = arith.constant 0 : index
    %10 = vector.load %arg10[%c0_18, %c0_19] : memref<32x64xbf16, #tpu.memory_space<vmem>>, vector<32x64xbf16>
    %c0_20 = arith.constant 0 : index
    %c0_21 = arith.constant 0 : index
    %11 = vector.load %arg11[%c0_20, %c0_21] : memref<1x64xf32, #tpu.memory_space<vmem>>, vector<1x64xf32>
    %c0_22 = arith.constant 0 : index
    %c0_23 = arith.constant 0 : index
    %12 = vector.load %arg12[%c0_22, %c0_23] : memref<64x32xbf16, #tpu.memory_space<vmem>>, vector<64x32xbf16>
    %c0_24 = arith.constant 0 : index
    %c0_25 = arith.constant 0 : index
    %13 = vector.load %arg13[%c0_24, %c0_25] : memref<1x32xf32, #tpu.memory_space<vmem>>, vector<1x32xf32>
    %cst = arith.constant dense<0.000000e+00> : vector<24xf32>
    %14 = vector.multi_reduction <add>, %1, %cst [1] : vector<24x32xf32> to vector<24xf32>
    %15 = vector.shape_cast %14 : vector<24xf32> to vector<24x1xf32>
    %cst_26 = arith.constant 3.200000e+01 : f32
    %16 = vector.broadcast %cst_26 : f32 to vector<24x1xf32>
    %17 = arith.divf %15, %16 : vector<24x1xf32>
    %18 = vector.broadcast %17 : vector<24x1xf32> to vector<24x32xf32>
    %19 = arith.subf %1, %18 : vector<24x32xf32>
    %20 = arith.mulf %19, %19 : vector<24x32xf32>
    %cst_27 = arith.constant dense<0.000000e+00> : vector<24xf32>
    %21 = vector.multi_reduction <add>, %20, %cst_27 [1] : vector<24x32xf32> to vector<24xf32>
    %22 = vector.shape_cast %21 : vector<24xf32> to vector<24x1xf32>
    %cst_28 = arith.constant 3.200000e+01 : f32
    %23 = vector.broadcast %cst_28 : f32 to vector<24x1xf32>
    %24 = arith.divf %22, %23 : vector<24x1xf32>
    %25 = vector.broadcast %17 : vector<24x1xf32> to vector<24x32xf32>
    %26 = arith.subf %1, %25 : vector<24x32xf32>
    %cst_29 = arith.constant 9.99999997E-7 : f32
    %27 = vector.broadcast %cst_29 : f32 to vector<24x1xf32>
    %28 = arith.addf %24, %27 : vector<24x1xf32>
    %29 = math.rsqrt %28 : vector<24x1xf32>
    %30 = vector.broadcast %29 : vector<24x1xf32> to vector<24x32xf32>
    %31 = arith.mulf %26, %30 : vector<24x32xf32>
    %32 = vector.broadcast %2 : vector<1x32xf32> to vector<24x32xf32>
    %33 = arith.mulf %31, %32 : vector<24x32xf32>
    %34 = vector.broadcast %3 : vector<1x32xf32> to vector<24x32xf32>
    %35 = arith.addf %33, %34 : vector<24x32xf32>
    %36 = arith.truncf %35 : vector<24x32xf32> to vector<24x32xbf16>
    %cst_30 = arith.constant dense<0.000000e+00> : vector<24x96xf32>
    %37 = tpu.matmul %36, %6, %cst_30 {dimension_numbers = #tpu.dot_dimension_numbers<[1], [0], [0], [1], [0, 0, 1, 1], [], []>} : vector<24x32xbf16>, vector<32x96xbf16>, vector<24x96xf32> -> vector<24x96xf32>
    %38 = vector.broadcast %7 : vector<1x96xf32> to vector<24x96xf32>
    %39 = arith.addf %37, %38 : vector<24x96xf32>
    %40 = vector.extract_strided_slice %39 {offsets = [0, 0], sizes = [24, 8], strides = [1, 1]} : vector<24x96xf32> to vector<24x8xf32>
    %41 = vector.shape_cast %40 : vector<24x8xf32> to vector<1x24x8xf32>
    %42 = vector.extract_strided_slice %39 {offsets = [0, 8], sizes = [24, 8], strides = [1, 1]} : vector<24x96xf32> to vector<24x8xf32>
    %43 = vector.shape_cast %42 : vector<24x8xf32> to vector<1x24x8xf32>
    %44 = vector.extract_strided_slice %39 {offsets = [0, 16], sizes = [24, 8], strides = [1, 1]} : vector<24x96xf32> to vector<24x8xf32>
    %45 = vector.shape_cast %44 : vector<24x8xf32> to vector<1x24x8xf32>
    %46 = vector.extract_strided_slice %39 {offsets = [0, 24], sizes = [24, 8], strides = [1, 1]} : vector<24x96xf32> to vector<24x8xf32>
    %47 = vector.shape_cast %46 : vector<24x8xf32> to vector<1x24x8xf32>
    %48 = tpu.concatenate %41, %43, %45, %47 in 0 : vector<1x24x8xf32>, vector<1x24x8xf32>, vector<1x24x8xf32>, vector<1x24x8xf32> -> vector<4x24x8xf32>
    %49 = arith.truncf %48 : vector<4x24x8xf32> to vector<4x24x8xbf16>
    %50 = vector.extract_strided_slice %39 {offsets = [0, 32], sizes = [24, 8], strides = [1, 1]} : vector<24x96xf32> to vector<24x8xf32>
    %51 = vector.shape_cast %50 : vector<24x8xf32> to vector<1x24x8xf32>
    %52 = vector.extract_strided_slice %39 {offsets = [0, 40], sizes = [24, 8], strides = [1, 1]} : vector<24x96xf32> to vector<24x8xf32>
    %53 = vector.shape_cast %52 : vector<24x8xf32> to vector<1x24x8xf32>
    %54 = vector.extract_strided_slice %39 {offsets = [0, 48], sizes = [24, 8], strides = [1, 1]} : vector<24x96xf32> to vector<24x8xf32>
    %55 = vector.shape_cast %54 : vector<24x8xf32> to vector<1x24x8xf32>
    %56 = vector.extract_strided_slice %39 {offsets = [0, 56], sizes = [24, 8], strides = [1, 1]} : vector<24x96xf32> to vector<24x8xf32>
    %57 = vector.shape_cast %56 : vector<24x8xf32> to vector<1x24x8xf32>
    %58 = tpu.concatenate %51, %53, %55, %57 in 0 : vector<1x24x8xf32>, vector<1x24x8xf32>, vector<1x24x8xf32>, vector<1x24x8xf32> -> vector<4x24x8xf32>
    %59 = arith.truncf %58 : vector<4x24x8xf32> to vector<4x24x8xbf16>
    %60 = vector.extract_strided_slice %39 {offsets = [0, 64], sizes = [24, 8], strides = [1, 1]} : vector<24x96xf32> to vector<24x8xf32>
    %61 = vector.shape_cast %60 : vector<24x8xf32> to vector<1x24x8xf32>
    %62 = vector.extract_strided_slice %39 {offsets = [0, 72], sizes = [24, 8], strides = [1, 1]} : vector<24x96xf32> to vector<24x8xf32>
    %63 = vector.shape_cast %62 : vector<24x8xf32> to vector<1x24x8xf32>
    %64 = vector.extract_strided_slice %39 {offsets = [0, 80], sizes = [24, 8], strides = [1, 1]} : vector<24x96xf32> to vector<24x8xf32>
    %65 = vector.shape_cast %64 : vector<24x8xf32> to vector<1x24x8xf32>
    %66 = vector.extract_strided_slice %39 {offsets = [0, 88], sizes = [24, 8], strides = [1, 1]} : vector<24x96xf32> to vector<24x8xf32>
    %67 = vector.shape_cast %66 : vector<24x8xf32> to vector<1x24x8xf32>
    %68 = tpu.concatenate %61, %63, %65, %67 in 0 : vector<1x24x8xf32>, vector<1x24x8xf32>, vector<1x24x8xf32>, vector<1x24x8xf32> -> vector<4x24x8xf32>
    %69 = arith.truncf %68 : vector<4x24x8xf32> to vector<4x24x8xbf16>
    %cst_31 = arith.constant dense<0.000000e+00> : vector<4x24x24xf32>
    %70 = tpu.matmul %49, %59, %cst_31 {dimension_numbers = #tpu.dot_dimension_numbers<[2], [2], [1], [1], [0, 0, 0, 1, 1, 1], [0], [0]>} : vector<4x24x8xbf16>, vector<4x24x8xbf16>, vector<4x24x24xf32> -> vector<4x24x24xf32>
    %cst_32 = arith.constant 0.353553385 : f32
    %71 = vector.broadcast %cst_32 : f32 to vector<4x24x24xf32>
    %72 = arith.mulf %70, %71 : vector<4x24x24xf32>
    %73 = tpu.iota {dimensions = array<i32: 2>} : vector<4x24x24xi32>
    %c17_i32 = arith.constant 17 : i32
    %74 = vector.broadcast %c17_i32 : i32 to vector<4x24x24xi32>
    %75 = arith.cmpi slt, %73, %74 : vector<4x24x24xi32>
    %cst_33 = arith.constant -1.000000e+30 : f32
    %76 = vector.broadcast %cst_33 : f32 to vector<4x24x24xf32>
    %77 = arith.select %75, %72, %76 : vector<4x24x24xi1>, vector<4x24x24xf32>
    %cst_34 = arith.constant dense<0xFF800000> : vector<4x24xf32>
    %78 = vector.multi_reduction <maximumf>, %77, %cst_34 [2] : vector<4x24x24xf32> to vector<4x24xf32>
    %79 = vector.shape_cast %78 : vector<4x24xf32> to vector<4x24x1xf32>
    %80 = vector.broadcast %79 : vector<4x24x1xf32> to vector<4x24x24xf32>
    %81 = arith.subf %77, %80 : vector<4x24x24xf32>
    %82 = math.exp %81 : vector<4x24x24xf32>
    %cst_35 = arith.constant dense<0.000000e+00> : vector<4x24xf32>
    %83 = vector.multi_reduction <add>, %82, %cst_35 [2] : vector<4x24x24xf32> to vector<4x24xf32>
    %84 = vector.shape_cast %83 : vector<4x24xf32> to vector<4x24x1xf32>
    %85 = tpu.reciprocal %84 {approx = true} : vector<4x24x1xf32> -> vector<4x24x1xf32>
    %86 = vector.broadcast %85 : vector<4x24x1xf32> to vector<4x24x24xf32>
    %87 = arith.mulf %82, %86 : vector<4x24x24xf32>
    %88 = arith.truncf %87 : vector<4x24x24xf32> to vector<4x24x24xbf16>
    %cst_36 = arith.constant dense<0.000000e+00> : vector<4x24x8xf32>
    %89 = tpu.matmul %88, %69, %cst_36 {dimension_numbers = #tpu.dot_dimension_numbers<[2], [1], [1], [2], [0, 0, 0, 1, 1, 2], [0], [0]>} : vector<4x24x24xbf16>, vector<4x24x8xbf16>, vector<4x24x8xf32> -> vector<4x24x8xf32>
    %90 = vector.extract_strided_slice %89 {offsets = [0, 0, 0], sizes = [1, 24, 8], strides = [1, 1, 1]} : vector<4x24x8xf32> to vector<1x24x8xf32>
    %91 = vector.shape_cast %90 : vector<1x24x8xf32> to vector<24x8xf32>
    %c0_37 = arith.constant 0 : index
    %c0_38 = arith.constant 0 : index
    %92 = vector.load %arg15[%c0_37, %c0_38] : memref<24x32xf32, #tpu.memory_space<vmem>>, vector<24x8xf32>
    tpu.vector_store %arg15[%c0_37, %c0_38], %91 {strides = array<i32>} : memref<24x32xf32, #tpu.memory_space<vmem>>, vector<24x8xf32>,
    %93 = vector.extract_strided_slice %89 {offsets = [1, 0, 0], sizes = [1, 24, 8], strides = [1, 1, 1]} : vector<4x24x8xf32> to vector<1x24x8xf32>
    %94 = vector.shape_cast %93 : vector<1x24x8xf32> to vector<24x8xf32>
    %c0_39 = arith.constant 0 : index
    %c8 = arith.constant 8 : index
    %95 = vector.load %arg15[%c0_39, %c8] : memref<24x32xf32, #tpu.memory_space<vmem>>, vector<24x8xf32>
    tpu.vector_store %arg15[%c0_39, %c8], %94 {strides = array<i32>} : memref<24x32xf32, #tpu.memory_space<vmem>>, vector<24x8xf32>,
    %96 = vector.extract_strided_slice %89 {offsets = [2, 0, 0], sizes = [1, 24, 8], strides = [1, 1, 1]} : vector<4x24x8xf32> to vector<1x24x8xf32>
    %97 = vector.shape_cast %96 : vector<1x24x8xf32> to vector<24x8xf32>
    %c0_40 = arith.constant 0 : index
    %c16 = arith.constant 16 : index
    %98 = vector.load %arg15[%c0_40, %c16] : memref<24x32xf32, #tpu.memory_space<vmem>>, vector<24x8xf32>
    tpu.vector_store %arg15[%c0_40, %c16], %97 {strides = array<i32>} : memref<24x32xf32, #tpu.memory_space<vmem>>, vector<24x8xf32>,
    %99 = vector.extract_strided_slice %89 {offsets = [3, 0, 0], sizes = [1, 24, 8], strides = [1, 1, 1]} : vector<4x24x8xf32> to vector<1x24x8xf32>
    %100 = vector.shape_cast %99 : vector<1x24x8xf32> to vector<24x8xf32>
    %c0_41 = arith.constant 0 : index
    %c24 = arith.constant 24 : index
    %101 = vector.load %arg15[%c0_41, %c24] : memref<24x32xf32, #tpu.memory_space<vmem>>, vector<24x8xf32>
    tpu.vector_store %arg15[%c0_41, %c24], %100 {strides = array<i32>} : memref<24x32xf32, #tpu.memory_space<vmem>>, vector<24x8xf32>,
    %c0_42 = arith.constant 0 : index
    %c0_43 = arith.constant 0 : index
    %102 = vector.load %arg15[%c0_42, %c0_43] : memref<24x32xf32, #tpu.memory_space<vmem>>, vector<24x32xf32>
    %103 = arith.truncf %102 : vector<24x32xf32> to vector<24x32xbf16>
    %cst_44 = arith.constant dense<0.000000e+00> : vector<24x32xf32>
    %104 = tpu.matmul %103, %8, %cst_44 {dimension_numbers = #tpu.dot_dimension_numbers<[1], [0], [0], [1], [0, 0, 1, 1], [], []>} : vector<24x32xbf16>, vector<32x32xbf16>, vector<24x32xf32> -> vector<24x32xf32>
    %105 = vector.broadcast %9 : vector<1x32xf32> to vector<24x32xf32>
    %106 = arith.addf %104, %105 : vector<24x32xf32>
    %107 = arith.addf %1, %106 : vector<24x32xf32>
    %cst_45 = arith.constant dense<0.000000e+00> : vector<24xf32>
    %108 = vector.multi_reduction <add>, %107, %cst_45 [1] : vector<24x32xf32> to vector<24xf32>
    %109 = vector.shape_cast %108 : vector<24xf32> to vector<24x1xf32>
    %cst_46 = arith.constant 3.200000e+01 : f32
    %110 = vector.broadcast %cst_46 : f32 to vector<24x1xf32>
    %111 = arith.divf %109, %110 : vector<24x1xf32>
    %112 = vector.broadcast %111 : vector<24x1xf32> to vector<24x32xf32>
    %113 = arith.subf %107, %112 : vector<24x32xf32>
    %114 = arith.mulf %113, %113 : vector<24x32xf32>
    %cst_47 = arith.constant dense<0.000000e+00> : vector<24xf32>
    %115 = vector.multi_reduction <add>, %114, %cst_47 [1] : vector<24x32xf32> to vector<24xf32>
    %116 = vector.shape_cast %115 : vector<24xf32> to vector<24x1xf32>
    %cst_48 = arith.constant 3.200000e+01 : f32
    %117 = vector.broadcast %cst_48 : f32 to vector<24x1xf32>
    %118 = arith.divf %116, %117 : vector<24x1xf32>
    %119 = vector.broadcast %111 : vector<24x1xf32> to vector<24x32xf32>
    %120 = arith.subf %107, %119 : vector<24x32xf32>
    %cst_49 = arith.constant 9.99999997E-7 : f32
    %121 = vector.broadcast %cst_49 : f32 to vector<24x1xf32>
    %122 = arith.addf %118, %121 : vector<24x1xf32>
    %123 = math.rsqrt %122 : vector<24x1xf32>
    %124 = vector.broadcast %123 : vector<24x1xf32> to vector<24x32xf32>
    %125 = arith.mulf %120, %124 : vector<24x32xf32>
    %126 = vector.broadcast %4 : vector<1x32xf32> to vector<24x32xf32>
    %127 = arith.mulf %125, %126 : vector<24x32xf32>
    %128 = vector.broadcast %5 : vector<1x32xf32> to vector<24x32xf32>
    %129 = arith.addf %127, %128 : vector<24x32xf32>
    %130 = arith.truncf %129 : vector<24x32xf32> to vector<24x32xbf16>
    %cst_50 = arith.constant dense<0.000000e+00> : vector<24x64xf32>
    %131 = tpu.matmul %130, %10, %cst_50 {dimension_numbers = #tpu.dot_dimension_numbers<[1], [0], [0], [1], [0, 0, 1, 1], [], []>} : vector<24x32xbf16>, vector<32x64xbf16>, vector<24x64xf32> -> vector<24x64xf32>
    %132 = vector.broadcast %11 : vector<1x64xf32> to vector<24x64xf32>
    %133 = arith.addf %131, %132 : vector<24x64xf32>
    %cst_51 = arith.constant 5.000000e-01 : f32
    %134 = vector.broadcast %cst_51 : f32 to vector<24x64xf32>
    %135 = arith.mulf %134, %133 : vector<24x64xf32>
    %cst_52 = arith.constant 0.707106769 : f32
    %136 = vector.broadcast %cst_52 : f32 to vector<24x64xf32>
    %137 = arith.mulf %133, %136 : vector<24x64xf32>
    %138 = math.erf %137 : vector<24x64xf32>
    %cst_53 = arith.constant 1.000000e+00 : f32
    %139 = vector.broadcast %cst_53 : f32 to vector<24x64xf32>
    %140 = arith.addf %139, %138 : vector<24x64xf32>
    %141 = arith.mulf %135, %140 : vector<24x64xf32>
    %142 = arith.truncf %141 : vector<24x64xf32> to vector<24x64xbf16>
    %cst_54 = arith.constant dense<0.000000e+00> : vector<24x32xf32>
    %143 = tpu.matmul %142, %12, %cst_54 {dimension_numbers = #tpu.dot_dimension_numbers<[1], [0], [0], [1], [0, 0, 1, 1], [], []>} : vector<24x64xbf16>, vector<64x32xbf16>, vector<24x32xf32> -> vector<24x32xf32>
    %144 = vector.broadcast %13 : vector<1x32xf32> to vector<24x32xf32>
    %145 = arith.addf %143, %144 : vector<24x32xf32>
    %146 = arith.addf %107, %145 : vector<24x32xf32>
    %c0_55 = arith.constant 0 : index
    %c0_56 = arith.constant 0 : index
    %c0_57 = arith.constant 0 : index
    %147 = vector.load %arg14[%c0_55, %c0_56, %c0_57] : memref<1x24x32xf32, #tpu.memory_space<vmem>>, vector<1x24x32xf32>
    %148 = vector.shape_cast %147 : vector<1x24x32xf32> to vector<24x32xf32>
    %149 = vector.shape_cast %146 : vector<24x32xf32> to vector<1x24x32xf32>
    tpu.vector_store %arg14[%c0_55, %c0_56, %c0_57], %149 {strides = array<i32>} : memref<1x24x32xf32, #tpu.memory_space<vmem>>, vector<1x24x32xf32>,
    return
  }
  func.func @transform_0(%arg0: i32) -> (i32, i32, i32) {
    %c0_i32 = arith.constant 0 : i32
    %c0_i32_0 = arith.constant 0 : i32
    %c0_i32_1 = arith.constant 0 : i32
    return %arg0, %c0_i32, %c0_i32_0 : i32, i32, i32
  }
  func.func @transform_1(%arg0: i32) -> (i32, i32) {
    %c0_i32 = arith.constant 0 : i32
    %c0_i32_0 = arith.constant 0 : i32
    %c0_i32_1 = arith.constant 0 : i32
    return %c0_i32, %c0_i32_0 : i32, i32
  }
  func.func @transform_2(%arg0: i32) -> (i32, i32) {
    %c0_i32 = arith.constant 0 : i32
    %c0_i32_0 = arith.constant 0 : i32
    %c0_i32_1 = arith.constant 0 : i32
    return %c0_i32, %c0_i32_0 : i32, i32
  }
  func.func @transform_3(%arg0: i32) -> (i32, i32) {
    %c0_i32 = arith.constant 0 : i32
    %c0_i32_0 = arith.constant 0 : i32
    %c0_i32_1 = arith.constant 0 : i32
    return %c0_i32, %c0_i32_0 : i32, i32
  }
  func.func @transform_4(%arg0: i32) -> (i32, i32) {
    %c0_i32 = arith.constant 0 : i32
    %c0_i32_0 = arith.constant 0 : i32
    %c0_i32_1 = arith.constant 0 : i32
    return %c0_i32, %c0_i32_0 : i32, i32
  }
  func.func @transform_5(%arg0: i32) -> (i32, i32) {
    %c0_i32 = arith.constant 0 : i32
    %c0_i32_0 = arith.constant 0 : i32
    %c0_i32_1 = arith.constant 0 : i32
    return %c0_i32, %c0_i32_0 : i32, i32
  }
  func.func @transform_6(%arg0: i32) -> (i32, i32) {
    %c0_i32 = arith.constant 0 : i32
    %c0_i32_0 = arith.constant 0 : i32
    %c0_i32_1 = arith.constant 0 : i32
    return %c0_i32, %c0_i32_0 : i32, i32
  }
  func.func @transform_7(%arg0: i32) -> (i32, i32) {
    %c0_i32 = arith.constant 0 : i32
    %c0_i32_0 = arith.constant 0 : i32
    %c0_i32_1 = arith.constant 0 : i32
    return %c0_i32, %c0_i32_0 : i32, i32
  }
  func.func @transform_8(%arg0: i32) -> (i32, i32) {
    %c0_i32 = arith.constant 0 : i32
    %c0_i32_0 = arith.constant 0 : i32
    %c0_i32_1 = arith.constant 0 : i32
    return %c0_i32, %c0_i32_0 : i32, i32
  }
  func.func @transform_9(%arg0: i32) -> (i32, i32) {
    %c0_i32 = arith.constant 0 : i32
    %c0_i32_0 = arith.constant 0 : i32
    %c0_i32_1 = arith.constant 0 : i32
    return %c0_i32, %c0_i32_0 : i32, i32
  }
  func.func @transform_10(%arg0: i32) -> (i32, i32) {
    %c0_i32 = arith.constant 0 : i32
    %c0_i32_0 = arith.constant 0 : i32
    %c0_i32_1 = arith.constant 0 : i32
    return %c0_i32, %c0_i32_0 : i32, i32
  }
  func.func @transform_11(%arg0: i32) -> (i32, i32) {
    %c0_i32 = arith.constant 0 : i32
    %c0_i32_0 = arith.constant 0 : i32
    %c0_i32_1 = arith.constant 0 : i32
    return %c0_i32, %c0_i32_0 : i32, i32
  }
  func.func @transform_12(%arg0: i32) -> (i32, i32) {
    %c0_i32 = arith.constant 0 : i32
    %c0_i32_0 = arith.constant 0 : i32
    %c0_i32_1 = arith.constant 0 : i32
    return %c0_i32, %c0_i32_0 : i32, i32
  }
  func.func @transform_13(%arg0: i32) -> (i32, i32, i32) {
    %c0_i32 = arith.constant 0 : i32
    %c0_i32_0 = arith.constant 0 : i32
    %c0_i32_1 = arith.constant 0 : i32
    return %arg0, %c0_i32, %c0_i32_0 : i32, i32, i32
  }
}

module attributes {stable_mosaic.version = 11 : i64} {
  func.func @head_kernel(%arg0: memref<2x32xf32, #tpu.memory_space<vmem>>, %arg1: memref<1x32xf32, #tpu.memory_space<vmem>>, %arg2: memref<1x32xf32, #tpu.memory_space<vmem>>, %arg3: memref<1x32xf32, #tpu.memory_space<vmem>>, %arg4: memref<1x32xf32, #tpu.memory_space<vmem>>, %arg5: memref<32x8xf32, #tpu.memory_space<vmem>>, %arg6: memref<1x8xf32, #tpu.memory_space<vmem>>, %arg7: memref<2x8xf32, #tpu.memory_space<vmem>>) attributes {dimension_semantics = [], scalar_prefetch = 0 : i64, scratch_operands = 0 : i64, tpu.core_type = #tpu.core_type<tc>} {
    %c0 = arith.constant 0 : index
    %c0_0 = arith.constant 0 : index
    %0 = vector.load %arg0[%c0, %c0_0] : memref<2x32xf32, #tpu.memory_space<vmem>>, vector<2x32xf32>
    %c0_1 = arith.constant 0 : index
    %c0_2 = arith.constant 0 : index
    %1 = vector.load %arg1[%c0_1, %c0_2] : memref<1x32xf32, #tpu.memory_space<vmem>>, vector<1x32xf32>
    %c0_3 = arith.constant 0 : index
    %c0_4 = arith.constant 0 : index
    %2 = vector.load %arg2[%c0_3, %c0_4] : memref<1x32xf32, #tpu.memory_space<vmem>>, vector<1x32xf32>
    %cst = arith.constant dense<0.000000e+00> : vector<2xf32>
    %3 = vector.multi_reduction <add>, %0, %cst [1] : vector<2x32xf32> to vector<2xf32>
    %4 = vector.shape_cast %3 : vector<2xf32> to vector<2x1xf32>
    %cst_5 = arith.constant 3.200000e+01 : f32
    %5 = vector.broadcast %cst_5 : f32 to vector<2x1xf32>
    %6 = arith.divf %4, %5 : vector<2x1xf32>
    %7 = vector.broadcast %6 : vector<2x1xf32> to vector<2x32xf32>
    %8 = arith.subf %0, %7 : vector<2x32xf32>
    %9 = arith.mulf %8, %8 : vector<2x32xf32>
    %cst_6 = arith.constant dense<0.000000e+00> : vector<2xf32>
    %10 = vector.multi_reduction <add>, %9, %cst_6 [1] : vector<2x32xf32> to vector<2xf32>
    %11 = vector.shape_cast %10 : vector<2xf32> to vector<2x1xf32>
    %cst_7 = arith.constant 3.200000e+01 : f32
    %12 = vector.broadcast %cst_7 : f32 to vector<2x1xf32>
    %13 = arith.divf %11, %12 : vector<2x1xf32>
    %14 = vector.broadcast %6 : vector<2x1xf32> to vector<2x32xf32>
    %15 = arith.subf %0, %14 : vector<2x32xf32>
    %cst_8 = arith.constant 9.99999997E-7 : f32
    %16 = vector.broadcast %cst_8 : f32 to vector<2x1xf32>
    %17 = arith.addf %13, %16 : vector<2x1xf32>
    %18 = math.rsqrt %17 : vector<2x1xf32>
    %19 = vector.broadcast %18 : vector<2x1xf32> to vector<2x32xf32>
    %20 = arith.mulf %15, %19 : vector<2x32xf32>
    %21 = vector.broadcast %1 : vector<1x32xf32> to vector<2x32xf32>
    %22 = arith.mulf %20, %21 : vector<2x32xf32>
    %23 = vector.broadcast %2 : vector<1x32xf32> to vector<2x32xf32>
    %24 = arith.addf %22, %23 : vector<2x32xf32>
    %c0_9 = arith.constant 0 : index
    %c0_10 = arith.constant 0 : index
    %25 = vector.load %arg3[%c0_9, %c0_10] : memref<1x32xf32, #tpu.memory_space<vmem>>, vector<1x32xf32>
    %c0_11 = arith.constant 0 : index
    %c0_12 = arith.constant 0 : index
    %26 = vector.load %arg4[%c0_11, %c0_12] : memref<1x32xf32, #tpu.memory_space<vmem>>, vector<1x32xf32>
    %cst_13 = arith.constant dense<0.000000e+00> : vector<2xf32>
    %27 = vector.multi_reduction <add>, %24, %cst_13 [1] : vector<2x32xf32> to vector<2xf32>
    %28 = vector.shape_cast %27 : vector<2xf32> to vector<2x1xf32>
    %cst_14 = arith.constant 3.200000e+01 : f32
    %29 = vector.broadcast %cst_14 : f32 to vector<2x1xf32>
    %30 = arith.divf %28, %29 : vector<2x1xf32>
    %31 = vector.broadcast %30 : vector<2x1xf32> to vector<2x32xf32>
    %32 = arith.subf %24, %31 : vector<2x32xf32>
    %33 = arith.mulf %32, %32 : vector<2x32xf32>
    %cst_15 = arith.constant dense<0.000000e+00> : vector<2xf32>
    %34 = vector.multi_reduction <add>, %33, %cst_15 [1] : vector<2x32xf32> to vector<2xf32>
    %35 = vector.shape_cast %34 : vector<2xf32> to vector<2x1xf32>
    %cst_16 = arith.constant 3.200000e+01 : f32
    %36 = vector.broadcast %cst_16 : f32 to vector<2x1xf32>
    %37 = arith.divf %35, %36 : vector<2x1xf32>
    %38 = vector.broadcast %30 : vector<2x1xf32> to vector<2x32xf32>
    %39 = arith.subf %24, %38 : vector<2x32xf32>
    %cst_17 = arith.constant 9.99999974E-6 : f32
    %40 = vector.broadcast %cst_17 : f32 to vector<2x1xf32>
    %41 = arith.addf %37, %40 : vector<2x1xf32>
    %42 = math.rsqrt %41 : vector<2x1xf32>
    %43 = vector.broadcast %42 : vector<2x1xf32> to vector<2x32xf32>
    %44 = arith.mulf %39, %43 : vector<2x32xf32>
    %45 = vector.broadcast %25 : vector<1x32xf32> to vector<2x32xf32>
    %46 = arith.mulf %44, %45 : vector<2x32xf32>
    %47 = vector.broadcast %26 : vector<1x32xf32> to vector<2x32xf32>
    %48 = arith.addf %46, %47 : vector<2x32xf32>
    %c0_18 = arith.constant 0 : index
    %c0_19 = arith.constant 0 : index
    %49 = vector.load %arg5[%c0_18, %c0_19] : memref<32x8xf32, #tpu.memory_space<vmem>>, vector<32x8xf32>
    %cst_20 = arith.constant dense<0.000000e+00> : vector<2x8xf32>
    %50 = tpu.matmul %48, %49, %cst_20 {dimension_numbers = #tpu.dot_dimension_numbers<[1], [0], [0], [1], [0, 0, 1, 1], [], []>} : vector<2x32xf32>, vector<32x8xf32>, vector<2x8xf32> -> vector<2x8xf32>
    %c0_21 = arith.constant 0 : index
    %c0_22 = arith.constant 0 : index
    %51 = vector.load %arg6[%c0_21, %c0_22] : memref<1x8xf32, #tpu.memory_space<vmem>>, vector<1x8xf32>
    %52 = vector.broadcast %51 : vector<1x8xf32> to vector<2x8xf32>
    %53 = arith.addf %50, %52 : vector<2x8xf32>
    %c0_23 = arith.constant 0 : index
    %c0_24 = arith.constant 0 : index
    %54 = vector.load %arg7[%c0_23, %c0_24] : memref<2x8xf32, #tpu.memory_space<vmem>>, vector<2x8xf32>
    tpu.vector_store %arg7[%c0_23, %c0_24], %53 {strides = array<i32>} : memref<2x8xf32, #tpu.memory_space<vmem>>, vector<2x8xf32>,
    return
  }
}

</mosaic_0001>

<bundles_post_ra>
// kernel: _lambda_.7
= control target key start
LH: loop header
LB: loop body
LE: loop exit
PB: predicated region body
PF: predicated region fallthrough
CT: control target
= control target key end

     0   :  { %vm30_vm0 = vcmask 254976   ;;  %s269_s0 = inlined_call_operand.vmem [shape: f32[2,32], index: 0, kind: input, shape index: {}]   ;;  %s270_s1 = inlined_call_operand.vmem [shape: f32[1,32], index: 1, kind: input, shape index: {}]   ;;  %s271_s2 = inlined_call_operand.vmem [shape: f32[1,32], index: 2, kind: input, shape index: {}]   ;;  %s272_s3 = inlined_call_operand.vmem [shape: f32[1,32], index: 3, kind: input, shape index: {}]   ;;  %s273_s4 = inlined_call_operand.vmem [shape: f32[1,32], index: 4, kind: input, shape index: {}]   ;;  %s274_s5 = inlined_call_operand.vmem [shape: f32[32,8], index: 5, kind: input, shape index: {}]   ;;  %s275_s6 = inlined_call_operand.vmem [shape: f32[1,8], index: 6, kind: input, shape index: {}]   ;;  %s276_s7 = inlined_call_operand.hbm [shape: f32[2,8], index: 7, kind: output, shape index: {}]  }
   0x1   :  { %v27_v0 = vld [vmem:[%s269_s0] sm:$0x3] }
   0x2   :  { %v31_v1 = vsel %vm30_vm0, %v27_v0, 0.0 }
   0x3   :  { %32 = vadd.xlane.f32.xlu0 %v31_v1 }
   0x4   :  { %12 = vsyncpa [#allocation3], 0  ;;  %v190_v2 = vmov 32.0   ;;  %v153_v23 = vld [vmem:[%s270_s1] ss:$0 sm:$0xff]  ;;  %v103_v35 = vld [vmem:[%s274_s5 + $0x18] sm:$0xff] }
   0x5   :  { %158 = vrcp.f32 %v190_v2  ;;  %v154_v26 = vld [vmem:[%s271_s2] ss:$0 sm:$0xff]  ;;  %124 = vmatpush.msra.mxu0 %v103_v35  ;;  %v102_v36 = vld [vmem:[%s274_s5 + $0x10] sm:$0xff]  ;;  %v101_v37 = vld [vmem:[%s274_s5 + $0x8] sm:$0xff]  ;;  %vm108_vm8 = vcmask 261120   ;;  %s191_s17 = smov [#allocation2]  }
   0x6   :  { %v100_v38 = vld [vmem:[%s274_s5] sm:$0xff]  ;;  %s139_s18 = sshll.u32 %s191_s17, 4  ;;  %vm132_vm9 = vcmask 58368   ;;  %s140_s18 = int_to_ptr.vmem [resolvable:$true] %s139_s18 }
   0x7   :  { %125 = vmatpush.msra.mxu0 %v102_v36  ;;  %v155_v48 = vld [vmem:[%s272_s3] ss:$0 sm:$0xff]  ;;  %s141_s3 = sshll.u32 %s276_s7, 4  ;;  %s142_s3 = int_to_ptr.hbm [resolvable:$true] %s141_s3 }
   0x8   :  { %v156_v51 = vld [vmem:[%s273_s4] ss:$0 sm:$0xff] }
   0x9   :  { %126 = vmatpush.msra.mxu0 %v101_v37  ;;  %v157_v54 = vld [vmem:[%s275_s6] ss:$0 sm:$0xff] }
   0xb   :  { %v159_v3 = vpop.eup %158  ;;  %127 = vmatpush.msra.mxu0 %v100_v38 }
   0xc   :  { %v35_v4 = vmul.f32 32.0, %v159_v3  ;;  %vm39_vm1 = vweird.f32 %v159_v3 }
   0xe   :  { %v36_v5 = vsub.f32 1.0, %v35_v4 }
  0x10   :  { %v37_v6 = vmul.f32 %v159_v3, %v36_v5 }
  0x12   :  { %v38_v7 = vadd.f32 %v159_v3, %v37_v6 }
  0x14   :  { %v40_v8 = vsel %vm39_vm1, %v159_v3, %v38_v7 }
  0x76   :  { %v33_v9 = vpop.xlane.xlu0 %32 }
  0x77   :  { %v41_v10 = vmul.f32 %v40_v8, %v33_v9 }
  0x79   :  { %v42_v11 = vsub.f32 %v27_v0, %v41_v10 }
  0x7b   :  { %v43_v12 = vmul.f32 %v42_v11, %v42_v11 }
  0x7d   :  { %v44_v13 = vsel %vm30_vm0, %v43_v12, 0.0 }
  0x7e   :  { %45 = vadd.xlane.f32.xlu0 %v44_v13 }
  0xf1   :  { %v46_v14 = vpop.xlane.xlu0 %45 }
  0xf2   :  { %v47_v15 = vmul.f32 %v46_v14, %v40_v8 }
  0xf4   :  { %v48_v16 = vadd.f32 1e-06, %v47_v15 }
  0xf6   :  { %160 = vrsqrt.f32 %v48_v16  ;;  %vm55_vm3 = vweird.f32 %v48_v16 }
  0xfc   :  { %v161_v17 = vpop.eup %160 }
  0xfd   :  { %v50_v18 = vmul.f32 %v161_v17, %v48_v16  ;;  %vm56_vm2 = vweird.f32 %v161_v17 }
  0xfe   :  { %vm57_vm4 = vmor %vm55_vm3, %vm56_vm2 }
  0xff   :  { %v51_v19 = vmul.f32 %v161_v17, %v50_v18 }
 0x101   :  { %v52_v20 = vmul.f32 0.5, %v51_v19 }
 0x103   :  { %v53_v21 = vsub.f32 1.5, %v52_v20 }
 0x105   :  { %v54_v22 = vmul.f32 %v161_v17, %v53_v21 }
 0x107   :  { %v58_v24 = vsel %vm57_vm4, %v161_v17, %v54_v22 }
 0x108   :  { %v59_v25 = vmul.f32 %v58_v24, %v42_v11 }
 0x10a   :  { %v63_v27 = vmul.f32 %v153_v23, %v59_v25 }
 0x10c   :  { %v67_v28 = vadd.f32 %v154_v26, %v63_v27 }
 0x10e   :  { %v70_v29 = vsel %vm30_vm0, %v67_v28, 0.0 }
 0x10f   :  { %71 = vadd.xlane.f32.xlu1 %v70_v29 }
 0x182   :  { %v72_v30 = vpop.xlane.xlu1 %71 }
 0x183   :  { %v73_v31 = vmul.f32 %v72_v30, %v40_v8 }
 0x185   :  { %v74_v32 = vsub.f32 %v67_v28, %v73_v31 }
 0x187   :  { %v75_v33 = vmul.f32 %v74_v32, %v74_v32 }
 0x189   :  { %v76_v34 = vsel %vm30_vm0, %v75_v33, 0.0 }
 0x18a   :  { %77 = vadd.xlane.f32.xlu1 %v76_v34 }
 0x1fd   :  { %v78_v39 = vpop.xlane.xlu1 %77 }
 0x1fe   :  { %v79_v40 = vmul.f32 %v78_v39, %v40_v8 }
 0x200   :  { %v80_v41 = vadd.f32 1e-05, %v79_v40 }
 0x202   :  { %162 = vrsqrt.f32 %v80_v41  ;;  %vm87_vm6 = vweird.f32 %v80_v41 }
 0x208   :  { %v163_v42 = vpop.eup %162 }
 0x209   :  { %v82_v43 = vmul.f32 %v163_v42, %v80_v41  ;;  %vm88_vm5 = vweird.f32 %v163_v42 }
 0x20a   :  { %vm89_vm7 = vmor %vm87_vm6, %vm88_vm5 }
 0x20b   :  { %v83_v44 = vmul.f32 %v163_v42, %v82_v43 }
 0x20d   :  { %v84_v45 = vmul.f32 0.5, %v83_v44 }
 0x20f   :  { %v85_v46 = vsub.f32 1.5, %v84_v45 }
 0x211   :  { %v86_v47 = vmul.f32 %v163_v42, %v85_v46 }
 0x213   :  { %v90_v49 = vsel %vm89_vm7, %v163_v42, %v86_v47 }
 0x214   :  { %v91_v50 = vmul.f32 %v90_v49, %v74_v32 }
 0x216   :  { %v95_v52 = vmul.f32 %v155_v48, %v91_v50 }
 0x218   :  { %v99_v53 = vadd.f32 %v156_v51, %v95_v52 }
 0x21a   :  { %150 = vmatmul.msk.f32.vlgmr.msra.gmra.mxu0 %vm108_vm8, %v99_v53 }
 0x297   :  { %v129_v55 = vpop.f32.mrf.mxu0 }
 0x298   :  { %v130_v56 = vadd.f32 %v157_v54, %v129_v55 }
 0x29a   :  { %133 = vst.msk [vmem:[#allocation2] sm:$0x3] %vm132_vm9, %v130_v56 }
 0x29b   :  { %144 = dma.vmem_to_hbm [thread:$0]  %s140_s18, 32, %s142_s3, [#allocation3]  }
 0x29c   :  { %188 = dma.done.wait [#allocation3], 32  }
 0x29d   :  { %189 = vsyncadd [#allocation3], 4294967264 }
 0x29e   :  { %149 = vsyncpa [#allocation3], 1 }

// kernel: _lambda_.4
= control target key start
LH: loop header
LB: loop body
LE: loop exit
PB: predicated region body
PF: predicated region fallthrough
CT: control target
= control target key end

     0   :  { %s440_s18 = smov 0   ;;  %s484_s0 = inlined_call_operand.vmem [shape: f32[2,16,64], index: 0, kind: input, shape index: {}]   ;;  %s485_s1 = inlined_call_operand.vmem [shape: bf16[64,32], index: 1, kind: input, shape index: {}]   ;;  %s486_s2 = inlined_call_operand.vmem [shape: f32[1,32], index: 2, kind: input, shape index: {}]   ;;  %s487_s3 = inlined_call_operand.vmem [shape: f32[1,32], index: 3, kind: input, shape index: {}]   ;;  %s488_s4 = inlined_call_operand.vmem [shape: f32[24,32], index: 4, kind: input, shape index: {}]   ;;  %s489_s5 = inlined_call_operand.vmem [shape: f32[2,24,32], index: 5, kind: output, shape index: {}]  }
   0x1 LB: > { %s360_s19 = sadd.s32 4294967295, %s408_s18   ;;  %p364_p0 = scmp.ge.s32.totalorder %s408_s18, 1  ;;  %s408_s18 = sphi %s440_s18, %s15_s18  }
   0x2   : > { %p187_p1 = scmp.lt.s32.totalorder %s408_s18, 3 }
   0x4   : > { %p188_p2 = pnand %p364_p0, %p187_p1 }
   0x5   : > { %p215_p3 = scmp.lt.s32.totalorder (!%p188_p2), %s360_s19, 1 }
   0x6   : > { %191 = sbr.rel (%p188_p2) target bundleno = 170 (0xaa), region = 40 }
   0xb   : > { %v391_v0 = vld [vmem:[%s485_s1 + $0x18] sm:$0xff]  ;;  %v390_v1 = vld [vmem:[%s485_s1 + $0x10] sm:$0xff]  ;;  %s491_s19 = smov (!%p215_p3, %s360_s19), 1  ;;  %v389_v2 = vld [vmem:[%s485_s1 + $0x8] sm:$0xff]  ;;  %vm265_vm0 = vcmask 523264   ;;  %vm286_vm1 = vcmask 1040384  }
   0xc   : > { %273 = vmatpush.bf16.msra.mxu0 %v391_v0  ;;  %s387_s24 = sshll.u32 %s491_s19, 4  ;;  %v388_v3 = vld [vmem:[%s485_s1] sm:$0xff]  ;;  %s392_s9 = smul.u32 24, %s491_s19  ;;  %vm301_vm2 = vcmask 261120   ;;  %v296_v18 = vld [vmem:[%s488_s4 + $0x8] sm:$0xff]  ;;  %v297_v19 = vld [vmem:[%s488_s4 + $0x10] sm:$0xff] }
   0xd   : > { %s219_s29 = scalar_lea.vmem %s484_s0, %s387_s24  ;;  %v401_v7 = vld [vmem:[%s486_s2] ss:$0 sm:$0xff] }
   0xe   : > { %v226_v4 = vld [vmem:[%s219_s29] sm:$0xff]  ;;  %v227_v5 = vld [vmem:[%s219_s29 + $0x8] sm:$0xff]  ;;  %s224_s16 = scalar_lea.vmem %s489_s5, %s392_s9 }
   0xf   : > { %v228_v6 = vpack.c.bf16 %v227_v5, %v226_v4  ;;  %v283_v10 = vld [vmem:[%s487_s3] sm:$0x1] }
  0x10   : > { %274 = vmatpush.bf16.msra.mxu0 %v390_v1  ;;  %v295_v12 = vld [vmem:[%s488_s4] sm:$0xff] }
  0x14   : > { %275 = vmatpush.bf16.msra.mxu0 %v389_v2 }
  0x18   : > { %276 = vmatpush.bf16.msra.mxu0 %v388_v3 }
  0x1b   : > { %384 = vmatmul.msk.bf16.vlgmr.msra.gmra.mxu0 %vm265_vm0, %v228_v6 }
  0x98   : > { %v278_v8 = vpop.f32.mrf.mxu0 }
  0x99   : > { %v279_v9 = vadd.f32 %v401_v7, %v278_v8 }
  0x9b   : > { %v287_v11 = vrot.slane %v279_v9, 7 }
  0x9d   : > { %v293_v13 = vsel %vm286_vm1, %v283_v10, %v287_v11 }
  0x9e   : > { %v298_v14 = vadd.f32 %v295_v12, %v293_v13 }
  0xa0   : > { %v280_v15 = vpop.f32.mrf.mxu0  ;;  %302 = vst.msk [vmem:[%s224_s16] sm:$0xff] %vm301_vm2, %v298_v14 }
  0xa1   : > { %v281_v16 = vadd.f32 %v401_v7, %v280_v15 }
  0xa3   : > { %v288_v17 = vrot.slane %v281_v16, 7 }
  0xa5   : > { %v289_v20 = vsel %vm286_vm1, %v287_v11, %v288_v17  ;;  %v294_v21 = vsel %vm286_vm1, %v288_v17, 0.0 }
  0xa6   : > { %v299_v22 = vadd.f32 %v296_v18, %v289_v20  ;;  %v300_v23 = vadd.f32 %v297_v19, %v294_v21 }
  0xa8   : > { %303 = vst.msk [vmem:[%s224_s16 + $0x8] sm:$0xff] %vm301_vm2, %v299_v22 }
  0xa9   : > { %304 = vst.msk [vmem:[%s224_s16 + $0x10] sm:$0xff] %vm301_vm2, %v300_v23 }
  0xaa PF: > { %s15_s18 = sadd.s32 1, %s408_s18  }
  0xab   : > { %p12_p4 = scmp.ge.s32.totalorder %s15_s18, 4  }
  0xad   :  { %14 = sbr.rel (!%p12_p4) target bundleno = 1 (0x1), region = 70 }

// kernel: _lambda_.5
= control target key start
LH: loop header
LB: loop body
LE: loop exit
PB: predicated region body
PF: predicated region fallthrough
CT: control target
= control target key end

     0   :  { %s1893_s25 = smov 0   ;;  %s2301_s0 = inlined_call_operand.vmem [shape: f32[2,24,32], index: 0, kind: input, shape index: {}]   ;;  %s2302_s1 = inlined_call_operand.vmem [shape: f32[1,32], index: 1, kind: input, shape index: {}]   ;;  %s2303_s2 = inlined_call_operand.vmem [shape: f32[1,32], index: 2, kind: input, shape index: {}]   ;;  %s2304_s3 = inlined_call_operand.vmem [shape: bf16[32,96], index: 3, kind: input, shape index: {}]   ;;  %s2305_s4 = inlined_call_operand.vmem [shape: f32[1,96], index: 4, kind: input, shape index: {}]   ;;  %s2306_s5 = inlined_call_operand.vmem [shape: bf16[32,32], index: 5, kind: input, shape index: {}]   ;;  %s2307_s6 = inlined_call_operand.vmem [shape: f32[1,32], index: 6, kind: input, shape index: {}]   ;;  %s2308_s7 = inlined_call_operand.vmem [shape: f32[1,32], index: 7, kind: input, shape index: {}]   ;;  %s2309_s8 = inlined_call_operand.vmem [shape: f32[1,32], index: 8, kind: input, shape index: {}]   ;;  %s2310_s9 = inlined_call_operand.vmem [shape: bf16[32,64], index: 9, kind: input, shape index: {}]   ;;  %s2311_s10 = inlined_call_operand.vmem [shape: f32[1,64], index: 10, kind: input, shape index: {}]   ;;  %s2312_s11 = inlined_call_operand.vmem [shape: bf16[64,32], index: 11, kind: input, shape index: {}]   ;;  %s2313_s12 = inlined_call_operand.vmem [shape: f32[1,32], index: 12, kind: input, shape index: {}]   ;;  %s2314_s13 = inlined_call_operand.vmem [shape: f32[2,24,32], index: 13, kind: output, shape index: {}]  }
   0x1 LB: > { %s1608_s26 = sadd.s32 4294967295, %s1812_s25   ;;  %p1612_p0 = scmp.ge.s32.totalorder %s1812_s25, 1  ;;  %s1812_s25 = sphi %s1893_s25, %s23_s25  }
   0x2   : > { %p387_p1 = scmp.lt.s32.totalorder %s1812_s25, 3 }
   0x4   : > { %p388_p2 = pnand %p1612_p0, %p387_p1 }
   0x5   : > { %p431_p3 = scmp.lt.s32.totalorder (!%p388_p2), %s1608_s26, 1  ;;  %s1815_s24 = smov (!%p388_p2), 120  }
   0x6   : > { %391 = sbr.rel (%p388_p2) target bundleno = 2153 (0x869), region = 72  ;;  %s1816_s28 = smov (!%p388_p2), 104  }
   0x7   : > { %s1817_s29 = smov (!%p388_p2), 112   ;;  %s1818_s14 = smov (!%p388_p2), 96  }
   0x8   : > { %s1819_s15 = smov (!%p388_p2), 64   ;;  %s1820_s16 = smov (!%p388_p2), 8  }
   0x9   : > { %s1821_s17 = smov (!%p388_p2), 16   ;;  %s1822_s18 = smov (!%p388_p2), 24  }
   0xb   : > { %s2316_s26 = smov (!%p431_p3, %s1608_s26), 1  ;;  %vm473_vm0 = vcmask 261120   ;;  %v1814_v6 = vmov 32.0   ;;  %v1685_v28 = vld [vmem:[%s2304_s3 + $0x8] sm:$0xff]  ;;  %v1684_v31 = vld [vmem:[%s2304_s3] sm:$0xff]  ;;  %vm654_vm11 = vcmask 64512  }
   0xc   : > { %s1694_s27 = smul.u32 24, %s2316_s26  ;;  %1735 = vrcp.f32 %v1814_v6  ;;  %588 = vmatpush.bf16.msra.mxu0 %v1685_v28  ;;  %v1727_v53 = vld [vmem:[%s2302_s1] ss:$0 sm:$0xff]  ;;  %vm1002_vm12 = vcmask 1043456   ;;  %vm838_vm14 = vcmask 195584   ;;  %vm1159_vm15 = vcmask 130112  }
   0xd   : > { %v1728_v60 = vld [vmem:[%s2303_s2] ss:$0 sm:$0xff] }
   0xe   : > { %s1909_s30 = scalar_lea.vmem %s2301_s0, %s1694_s27  ;;  %s440_s19 = scalar_lea.vmem %s2314_s13, %s1694_s27 }
   0xf   : > { %v442_v0 = vld [vmem:[%s1909_s30] sm:$0xff]  ;;  %v444_v1 = vld [vmem:[%s1909_s30 + $0x10] sm:$0xff]  ;;  %v443_v4 = vld [vmem:[%s1909_s30 + $0x8] sm:$0xff] }
  0x10   : > { %v474_v2 = vsel %vm473_vm0, %v442_v0, 0.0  ;;  %v480_v3 = vsel %vm473_vm0, %v444_v1, 0.0  ;;  %v477_v5 = vsel %vm473_vm0, %v443_v4, 0.0  ;;  %589 = vmatpush.bf16.msra.mxu0 %v1684_v31 }
  0x11   : > { %475 = vadd.xlane.f32.xlu0 %v474_v2  ;;  %481 = vadd.xlane.f32.xlu1 %v480_v3 }
  0x12   : > { %v1736_v7 = vpop.eup %1735 }
  0x13   : > { %v484_v8 = vmul.f32 32.0, %v1736_v7  ;;  %vm488_vm1 = vweird.f32 %v1736_v7 }
  0x15   : > { %v485_v9 = vsub.f32 1.0, %v484_v8 }
  0x17   : > { %v486_v10 = vmul.f32 %v1736_v7, %v485_v9 }
  0x19   : > { %478 = vadd.xlane.f32.xlu0 %v477_v5  ;;  %v487_v11 = vadd.f32 %v1736_v7, %v486_v10  ;;  %v1729_v10 = vld [vmem:[%s2305_s4] ss:$0 sm:$0xff] }
  0x1b   : > { %v1917_v12 = vsel %vm488_vm1, %v1736_v7, %v487_v11  ;;  %vm1175_vm1 = vcmask 195712  }
  0x84   : > { %v476_v13 = vpop.xlane.xlu0 %475  ;;  %v482_v17 = vpop.xlane.xlu1 %481 }
  0x85   : > { %v490_v14 = vmul.f32 %v1917_v12, %v476_v13  ;;  %v492_v21 = vmul.f32 %v1917_v12, %v482_v17 }
  0x87   : > { %v493_v15 = vsub.f32 %v442_v0, %v490_v14  ;;  %v1923_v23 = vsub.f32 %v444_v1, %v492_v21 }
  0x89   : > { %v496_v16 = vmul.f32 %v493_v15, %v493_v15  ;;  %v498_v26 = vmul.f32 %v1923_v23, %v1923_v23 }
  0x8b   : > { %v499_v18 = vsel %vm473_vm0, %v496_v16, 0.0  ;;  %v505_v27 = vsel %vm473_vm0, %v498_v26, 0.0 }
  0x8c   : > { %500 = vadd.xlane.f32.xlu1 %v499_v18  ;;  %v479_v19 = vpop.xlane.xlu0 %478 }
  0x8d   : > { %v491_v20 = vmul.f32 %v1917_v12, %v479_v19 }
  0x8f   : > { %v494_v22 = vsub.f32 %v443_v4, %v491_v20 }
  0x91   : > { %v497_v24 = vmul.f32 %v494_v22, %v494_v22 }
  0x93   : > { %v502_v25 = vsel %vm473_vm0, %v497_v24, 0.0 }
  0x94   : > { %503 = vadd.xlane.f32.xlu2 %v502_v25 }
  0x9c   : > { %506 = vadd.xlane.f32.xlu2 %v505_v27 }
  0xff   : > { %v501_v29 = vpop.xlane.xlu1 %500 }
 0x100   : > { %v508_v30 = vmul.f32 %v501_v29, %v1917_v12 }
 0x102   : > { %v511_v32 = vadd.f32 1e-06, %v508_v30 }
 0x104   : > { %1737 = vrsqrt.f32 %v511_v32  ;;  %vm520_vm3 = vweird.f32 %v511_v32 }
 0x107   : > { %v504_v33 = vpop.xlane.xlu2 %503 }
 0x108   : > { %v509_v34 = vmul.f32 %v504_v33, %v1917_v12 }
 0x10a   : > { %v1738_v35 = vpop.eup %1737  ;;  %v512_v36 = vadd.f32 1e-06, %v509_v34 }
 0x10b   : > { %v515_v37 = vmul.f32 %v1738_v35, %v511_v32  ;;  %vm521_vm2 = vweird.f32 %v1738_v35 }
 0x10c   : > { %1739 = vrsqrt.f32 %v512_v36  ;;  %vm522_vm4 = vmor %vm520_vm3, %vm521_vm2  ;;  %vm530_vm6 = vweird.f32 %v512_v36  ;;  %vm1191_vm2 = vcmask 261312  }
 0x10d   : > { %v516_v38 = vmul.f32 %v1738_v35, %v515_v37 }
 0x10f   : > { %v517_v39 = vmul.f32 0.5, %v516_v38  ;;  %v507_v40 = vpop.xlane.xlu2 %506 }
 0x110   : > { %v510_v41 = vmul.f32 %v507_v40, %v1917_v12 }
 0x111   : > { %v518_v42 = vsub.f32 1.5, %v517_v39 }
 0x112   : > { %v1740_v43 = vpop.eup %1739  ;;  %v513_v44 = vadd.f32 1e-06, %v510_v41 }
 0x113   : > { %v519_v45 = vmul.f32 %v1738_v35, %v518_v42  ;;  %v525_v46 = vmul.f32 %v1740_v43, %v512_v36  ;;  %vm531_vm5 = vweird.f32 %v1740_v43 }
 0x114   : > { %1741 = vrsqrt.f32 %v513_v44  ;;  %vm532_vm7 = vmor %vm530_vm6, %vm531_vm5  ;;  %vm540_vm8 = vweird.f32 %v513_v44 }
 0x115   : > { %v526_v47 = vmul.f32 %v1740_v43, %v525_v46  ;;  %v523_v48 = vsel %vm522_vm4, %v1738_v35, %v519_v45 }
 0x116   : > { %v544_v52 = vmul.f32 %v523_v48, %v493_v15 }
 0x117   : > { %v527_v49 = vmul.f32 0.5, %v526_v47 }
 0x118   : > { %v550_v59 = vmul.f32 %v1727_v53, %v544_v52 }
 0x119   : > { %v528_v50 = vsub.f32 1.5, %v527_v49 }
 0x11a   : > { %v1742_v51 = vpop.eup %1741  ;;  %v556_v0 = vadd.f32 %v1728_v60, %v550_v59 }
 0x11b   : > { %v529_v54 = vmul.f32 %v1740_v43, %v528_v50  ;;  %v535_v55 = vmul.f32 %v1742_v51, %v513_v44  ;;  %vm541_vm9 = vweird.f32 %v1742_v51 }
 0x11c   : > { %vm542_vm10 = vmor %vm540_vm8, %vm541_vm9 }
 0x11d   : > { %v533_v56 = vsel %vm532_vm7, %v1740_v43, %v529_v54  ;;  %v536_v57 = vmul.f32 %v1742_v51, %v535_v55 }
 0x11e   : > { %v545_v58 = vmul.f32 %v533_v56, %v494_v22 }
 0x11f   : > { %v537_v61 = vmul.f32 0.5, %v536_v57 }
 0x120   : > { %v551_v62 = vmul.f32 %v1727_v53, %v545_v58 }
 0x121   : > { %v538_v63 = vsub.f32 1.5, %v537_v61 }
 0x122   : > { %v557_v1 = vadd.f32 %v1728_v60, %v551_v62 }
 0x123   : > { %v539_v2 = vmul.f32 %v1742_v51, %v538_v63 }
 0x124   : > { %v559_v3 = vpack.c.bf16 %v557_v1, %v556_v0 }
 0x125   : > { %v543_v4 = vsel %vm542_vm10, %v1742_v51, %v539_v2 }
 0x126   : > { %1623 = vmatmul.msk.bf16.vlgmr.msra.gmra.mxu0 %vm473_vm0, %v559_v3  ;;  %v546_v5 = vmul.f32 %v543_v4, %v1923_v23 }
 0x128   : > { %v552_v6 = vmul.f32 %v1727_v53, %v546_v5 }
 0x12a   : > { %v558_v7 = vadd.f32 %v1728_v60, %v552_v6 }
 0x12c   : > { %v560_v8 = vpack.c.bf16 %v558_v7, %v558_v7 }
 0x136   : > { %1624 = vmatmul.msk.bf16.gmra.mxu0 %vm473_vm0, %v560_v8 }
 0x1a3   : > { %v591_v9 = vpop.f32.mrf.mxu0 }
 0x1a4   : > { %v592_v11 = vadd.f32 %v1729_v10, %v591_v9 }
 0x1a6   : > { %v630_v15 = vpack.c.bf16 %v592_v11, %v592_v11 }
 0x1a8   : > { %v645_v17 = vunpack.c.l.b16 %v630_v15 }
 0x1ab   : > { %v593_v13 = vpop.f32.mrf.mxu0 }
 0x1ac   : > { %v594_v14 = vadd.f32 %v1729_v10, %v593_v13 }
 0x1ae   : > { %605 = vrot.lane.b32.xlu2 %v594_v14, %s1815_s24  ;;  %v631_v16 = vpack.c.bf16 %v594_v14, %v594_v14  ;;  %v1722_v24 = vpack.i.bf16 %v594_v14, %v592_v11 }
 0x1b0   : > { %v646_v18 = vunpack.c.l.b16 %v631_v16 }
 0x1b2   : > { %v1950_v19 = vpack.c.b16 %v646_v18, %v645_v17 }
 0x1b3   : > { %v596_v20 = vpop.f32.mrf.mxu0 }
 0x1b4   : > { %v597_v21 = vadd.f32 %v1729_v10, %v596_v20 }
 0x1b6   : > { %625 = vrot.lane.b32.xlu2 %v597_v21, %s1816_s28  ;;  %616 = vrot.lane.b32.xlu1 %v597_v21, %s1817_s29  ;;  %v1712_v22 = vpack.i.bf16 %v592_v11, %v597_v21  ;;  %v632_v61 = vpack.c.bf16 %v597_v21, %v597_v21 }
 0x1b8   : > { %1713 = vrot.lane.b32.xlu0 %v1712_v22, %s1815_s24  ;;  %v647_v62 = vunpack.c.l.b16 %v632_v61 }
 0x1ba   : > { %v1975_v63 = vpack.c.b16 %v647_v62, %v647_v62 }
 0x1bb   : > { %v598_v23 = vpop.f32.mrf.mxu0 }
 0x1bc   : > { %v823_v23 = vlaneseq }
 0x1be   : > { %1723 = vrot.lane.b32.xlu1 %v1722_v24, %s1816_s28 }
 0x1c0   : > { %1718 = vrot.lane.b32.xlu0 %v1722_v24, %s1817_s29  ;;  %v2009_v24 = vand.u32 127, %v823_v23 }
 0x1c2   : > { %vm825_vm13 = vcmp.lt.s32.totalorder %v2009_v24, 17 }
 0x208   : > { %v606_v25 = vpop.permute.xlu2 %605 }
 0x209   : > { %v634_v30 = vpack.c.bf16 %v606_v25, %v606_v25 }
 0x20b   : > { %v689_v38 = vunpack.c.l.b16 %v634_v30 }
 0x210   : > { %v626_v27 = vpop.permute.xlu2 %625 }
 0x211   : > { %v641_v34 = vpack.c.bf16 %v626_v27, %v626_v27 }
 0x213   : > { %v774_v41 = vunpack.c.l.b16 %v641_v34 }
 0x215   : > { %v1961_v52 = vpack.c.b16 %v774_v41, %v774_v41 }
 0x228   : > { %v617_v26 = vpop.permute.xlu1 %616 }
 0x229   : > { %v638_v28 = vpack.c.bf16 %v617_v26, %v617_v26 }
 0x22a   : > { %v1714_v29 = vpop.permute.xlu0 %1713 }
 0x22b   : > { %v732_v31 = vunpack.c.l.b16 %v638_v28  ;;  %v1716_v32 = vunpack.i.h.bf16 %v1714_v29  ;;  %v1715_v33 = vunpack.i.l.bf16 %v1714_v29 }
 0x22d   : > { %v1952_v35 = vpack.c.b16 %v732_v31, %v732_v31  ;;  %v633_v36 = vpack.c.bf16 %v1716_v32, %v1716_v32  ;;  %v635_v37 = vpack.c.bf16 %v1715_v33, %v1715_v33 }
 0x22f   : > { %v688_v39 = vunpack.c.l.b16 %v633_v36  ;;  %v690_v40 = vunpack.c.l.b16 %v635_v37  ;;  %737 = vrot.lane.b32.xlu2 %v1952_v35, %s1818_s14 }
 0x230   : > { %v1724_v42 = vpop.permute.xlu1 %1723 }
 0x231   : > { %v1956_v43 = vpack.c.b16 %v690_v40, %v690_v40  ;;  %v1726_v44 = vunpack.i.h.bf16 %v1724_v42  ;;  %v1725_v45 = vunpack.i.l.bf16 %v1724_v42  ;;  %v691_v46 = vpack.c.b16 %v689_v38, %v688_v39 }
 0x232   : > { %v1719_v47 = vpop.permute.xlu0 %1718 }
 0x233   : > { %v640_v48 = vpack.c.bf16 %v1726_v44, %v1726_v44  ;;  %v639_v49 = vpack.c.bf16 %v1725_v45, %v1725_v45  ;;  %v1721_v50 = vunpack.i.h.bf16 %v1719_v47  ;;  %v1720_v51 = vunpack.i.l.bf16 %v1719_v47  ;;  %695 = vrot.lane.b32.xlu0 %v1956_v43, %s1818_s14  ;;  %693 = vrot.lane.b32.xlu1 %v691_v46, %s1818_s14 }
 0x235   : > { %v773_v53 = vunpack.c.l.b16 %v640_v48  ;;  %v772_v54 = vunpack.c.l.b16 %v639_v49  ;;  %v637_v55 = vpack.c.bf16 %v1721_v50, %v1721_v50  ;;  %v636_v56 = vpack.c.bf16 %v1720_v51, %v1720_v51 }
 0x237   : > { %v731_v57 = vunpack.c.l.b16 %v637_v55  ;;  %v730_v58 = vunpack.c.l.b16 %v636_v56  ;;  %779 = vrot.lane.b32.xlu2 %v1961_v52, %s1818_s14  ;;  %v1967_v60 = vpack.c.b16 %v773_v53, %v772_v54 }
 0x239   : > { %v1965_v59 = vpack.c.b16 %v731_v57, %v730_v58 }
 0x23b   : > { %735 = vrot.lane.b32.xlu0 %v1965_v59, %s1818_s14  ;;  %777 = vrot.lane.b32.xlu1 %v1967_v60, %s1818_s14 }
 0x23f   : > { %650 = vrot.lane.b32.xlu2 %v1950_v19, %s1818_s14 }
 0x243   : > { %652 = vrot.lane.b32.xlu0 %v1975_v63, %s1818_s14  ;;  %1074 = vrot.lane.b32.xlu1 %v1952_v35, %s1819_s15 }
 0x247   : > { %1034 = vrot.lane.b32.xlu2 %v1956_v43, %s1819_s15 }
 0x24b   : > { %1032 = vrot.lane.b32.xlu0 %v691_v46, %s1819_s15 }
 0x289   : > { %v738_v0 = vpop.permute.xlu2 %737 }
 0x28a   : > { %v749_v1 = vsel %vm654_vm11, %v738_v0, 0 }
 0x28b   : > { %757 = vmatpush.bf16.xpose.msra.mxu3 %v749_v1 }
 0x291   : > { %v780_v2 = vpop.permute.xlu2 %779 }
 0x292   : > { %v791_v3 = vsel %vm654_vm11, %v780_v2, 0 }
 0x293   : > { %799 = vmatpush.bf16.xpose.msrb.mxu0 %v791_v3 }
 0x299   : > { %v651_v4 = vpop.permute.xlu2 %650 }
 0x29a   : > { %v662_v22 = vsel %vm654_vm11, %v651_v4, 0 }
 0x2a1   : > { %v1035_v8 = vpop.permute.xlu2 %1034 }
 0x2a2   : > { %v1044_v15 = vsel %vm1002_vm12, %v1035_v8, 0 }
 0x2a5   : > { %v696_v5 = vpop.permute.xlu0 %695  ;;  %v694_v6 = vpop.permute.xlu1 %693 }
 0x2a6   : > { %v707_v7 = vsel %vm654_vm11, %v696_v5, 0  ;;  %v704_v11 = vsel %vm654_vm11, %v694_v6, 0 }
 0x2a7   : > { %715 = vmatpush.bf16.xpose.msra.mxu2 %v707_v7 }
 0x2ad   : > { %v736_v9 = vpop.permute.xlu0 %735  ;;  %v778_v10 = vpop.permute.xlu1 %777 }
 0x2ae   : > { %v746_v13 = vsel %vm654_vm11, %v736_v9, 0  ;;  %v788_v14 = vsel %vm654_vm11, %v778_v10, 0 }
 0x2af   : > { %716 = vmatpush.bf16.xpose.msra.mxu2 %v704_v11  ;;  %758 = vmatpush.bf16.xpose.msra.mxu3 %v746_v13 }
 0x2b0   : > { %800 = vmatpush.bf16.xpose.msrb.mxu0 %v788_v14 }
 0x2b5   : > { %v653_v16 = vpop.permute.xlu0 %652  ;;  %v1075_v17 = vpop.permute.xlu1 %1074 }
 0x2b6   : > { %1627 = vmatmul.msk.bf16.vlgmr.msra.gmra.mxu2 %vm654_vm11, %v691_v46  ;;  %1629 = vmatmul.msk.bf16.vlgmr.msra.gmra.mxu3 %vm654_vm11, %v1965_v59  ;;  %v665_v18 = vsel %vm654_vm11, %v653_v16, 0  ;;  %v1084_v20 = vsel %vm1002_vm12, %v1075_v17, 0 }
 0x2b7   : > { %1052 = vmatpush.bf16.msrb.mxu2 %v1044_v15  ;;  %1631 = vmatmul.msk.bf16.vlgmr.msrb.gmra.mxu0 %vm654_vm11, %v1967_v60 }
 0x2b8   : > { %673 = vmatpush.bf16.xpose.msra.mxu1 %v665_v18  ;;  %1092 = vmatpush.bf16.msrb.mxu3 %v1084_v20 }
 0x2bd   : > { %v1033_v21 = vpop.permute.xlu0 %1032 }
 0x2be   : > { %1053 = vmatpush.bf16.msrb.mxu2 %v1033_v21 }
 0x2c0   : > { %674 = vmatpush.bf16.xpose.msra.mxu1 %v662_v22 }
 0x2c6   : > { %1628 = vmatmul.msk.bf16.gmra.mxu2 %vm654_vm11, %v1956_v43  ;;  %1630 = vmatmul.msk.bf16.gmra.mxu3 %vm654_vm11, %v1952_v35 }
 0x2c7   : > { %1625 = vmatmul.msk.bf16.vlgmr.msra.gmra.mxu1 %vm654_vm11, %v1950_v19  ;;  %1632 = vmatmul.msk.bf16.gmra.mxu0 %vm654_vm11, %v1961_v52 }
 0x2d7   : > { %1626 = vmatmul.msk.bf16.gmra.mxu1 %vm654_vm11, %v1975_v63 }
 0x334   : > { %v802_v25 = vpop.f32.mrf.mxu0 }
 0x335   : > { %v820_v26 = vmul.f32 0.35355338, %v802_v25 }
 0x337   : > { %v2014_v27 = vsel %vm825_vm13, %v820_v26, -1e+30 }
 0x338   : > { %v866_v28 = vsel %vm838_vm14, %v2014_v27, -inf }
 0x339   : > { %867 = vmax.xlane.f32.xlu0 %v866_v28  ;;  %v718_v29 = vpop.f32.mrf.mxu2  ;;  %v760_v30 = vpop.f32.mrf.mxu3 }
 0x33a   : > { %v817_v42 = vmul.f32 0.35355338, %v760_v30  ;;  %v814_v53 = vmul.f32 0.35355338, %v718_v29 }
 0x33c   : > { %v804_v31 = vpop.f32.mrf.mxu0  ;;  %v832_v48 = vsel %vm825_vm13, %v817_v42, -1e+30  ;;  %v829_v62 = vsel %vm825_vm13, %v814_v53, -1e+30 }
 0x33d   : > { %v857_v50 = vsel %vm838_vm14, %v832_v48, -inf  ;;  %v821_v54 = vmul.f32 0.35355338, %v804_v31  ;;  %v848_v2 = vsel %vm838_vm14, %v829_v62, -inf }
 0x33f   : > { %v836_v61 = vsel %vm825_vm13, %v821_v54, -1e+30 }
 0x340   : > { %v869_v1 = vsel %vm838_vm14, %v836_v61, -inf }
 0x341   : > { %v720_v32 = vpop.f32.mrf.mxu2  ;;  %v762_v33 = vpop.f32.mrf.mxu3 }
 0x342   : > { %v815_v34 = vmul.f32 0.35355338, %v720_v32  ;;  %v818_v3 = vmul.f32 0.35355338, %v762_v33 }
 0x344   : > { %v676_v35 = vpop.f32.mrf.mxu1  ;;  %v807_v37 = vpop.f32.mrf.mxu0  ;;  %v830_v38 = vsel %vm825_vm13, %v815_v34, -1e+30  ;;  %v833_v5 = vsel %vm825_vm13, %v818_v3, -1e+30 }
 0x345   : > { %v811_v36 = vmul.f32 0.35355338, %v676_v35  ;;  %v851_v39 = vsel %vm838_vm14, %v830_v38, -inf  ;;  %v860_v6 = vsel %vm838_vm14, %v833_v5, -inf }
 0x346   : > { %852 = vmax.xlane.f32.xlu0 %v851_v39 }
 0x347   : > { %v2023_v40 = vsel %vm825_vm13, %v811_v36, -1e+30 }
 0x348   : > { %v839_v41 = vsel %vm838_vm14, %v2023_v40, -inf }
 0x349   : > { %840 = vmax.xlane.f32.xlu2 %v839_v41  ;;  %v723_v43 = vpop.f32.mrf.mxu2  ;;  %v765_v44 = vpop.f32.mrf.mxu3 }
 0x34a   : > { %v816_v7 = vmul.f32 0.35355338, %v723_v43  ;;  %v819_v13 = vmul.f32 0.35355338, %v765_v44 }
 0x34c   : > { %v678_v45 = vpop.f32.mrf.mxu1  ;;  %v809_v47 = vpop.f32.mrf.mxu0  ;;  %v2053_v8 = vsel %vm825_vm13, %v816_v7, -1e+30  ;;  %v2067_v14 = vsel %vm825_vm13, %v819_v13, -1e+30 }
 0x34d   : > { %v812_v46 = vmul.f32 0.35355338, %v678_v45  ;;  %v854_v9 = vsel %vm838_vm14, %v2053_v8, -inf  ;;  %v863_v15 = vsel %vm838_vm14, %v2067_v14, -inf }
 0x34f   : > { %v2031_v49 = vsel %vm825_vm13, %v812_v46, -1e+30 }
 0x350   : > { %v842_v51 = vsel %vm838_vm14, %v2031_v49, -inf }
 0x351   : > { %858 = vmax.xlane.f32.xlu2 %v857_v50  ;;  %843 = vmax.xlane.f32.xlu1 %v842_v51  ;;  %v725_v55 = vpop.f32.mrf.mxu2  ;;  %v767_v56 = vpop.f32.mrf.mxu3 }
 0x354   : > { %v681_v57 = vpop.f32.mrf.mxu1 }
 0x355   : > { %v813_v58 = vmul.f32 0.35355338, %v681_v57 }
 0x357   : > { %v2042_v0 = vsel %vm825_vm13, %v813_v58, -1e+30 }
 0x359   : > { %870 = vmax.xlane.f32.xlu2 %v869_v1  ;;  %849 = vmax.xlane.f32.xlu1 %v848_v2 }
 0x35a   : > { %1114 = vrot.lane.b32.xlu0 %v1961_v52, %s1819_s15  ;;  %v822_v52 = vmul.f32 0.35355338, %v807_v37 }
 0x35c   : > { %v683_v4 = vpop.f32.mrf.mxu1  ;;  %v2061_v10 = vsel %vm825_vm13, %v822_v52, -1e+30 }
 0x35d   : > { %v872_v11 = vsel %vm838_vm14, %v2061_v10, -inf }
 0x361   : > { %861 = vmax.xlane.f32.xlu1 %v860_v6 }
 0x369   : > { %855 = vmax.xlane.f32.xlu1 %v854_v9 }
 0x371   : > { %1072 = vrot.lane.b32.xlu2 %v1965_v59, %s1819_s15 }
 0x384   : > { %873 = vmax.xlane.f32.xlu0 %v872_v11 }
 0x38c   : > { %864 = vmax.xlane.f32.xlu0 %v863_v15 }
 0x3ac   : > { %v868_v16 = vpop.xlane.xlu0 %867 }
 0x3ad   : > { %v884_v59 = vsub.f32 %v2014_v27, %v868_v16 }
 0x3af   : > { %v905_v17 = vmul.f32 1.442695, %v884_v59 }
 0x3b1   : > { %1743 = vpow2.f32 %v905_v17 }
 0x3b7   : > { %v2072_v18 = vpop.eup %1743 }
 0x3b8   : > { %v938_v20 = vsel %vm838_vm14, %v2072_v18, 0.0 }
 0x3b9   : > { %939 = vadd.xlane.f32.xlu1 %v938_v20  ;;  %v853_v21 = vpop.xlane.xlu0 %852 }
 0x3ba   : > { %v879_v22 = vsub.f32 %v830_v38, %v853_v21 }
 0x3bc   : > { %v841_v23 = vpop.xlane.xlu2 %840  ;;  %v895_v24 = vmul.f32 1.442695, %v879_v22 }
 0x3bd   : > { %v875_v57 = vsub.f32 %v2023_v40, %v841_v23  ;;  %v845_v40 = vsel %vm838_vm14, %v2042_v0, -inf }
 0x3be   : > { %1745 = vpow2.f32 %v895_v24 }
 0x3bf   : > { %v887_v1 = vmul.f32 1.442695, %v875_v57 }
 0x3c4   : > { %v844_v25 = vpop.xlane.xlu1 %843  ;;  %v859_v26 = vpop.xlane.xlu2 %858 }
 0x3c5   : > { %v2076_v28 = vpop.eup %1745  ;;  %v881_v29 = vsub.f32 %v832_v48, %v859_v26  ;;  %v876_v41 = vsub.f32 %v2031_v49, %v844_v25 }
 0x3c6   : > { %v923_v27 = vsel %vm838_vm14, %v2076_v28, 0.0 }
 0x3c7   : > { %v899_v30 = vmul.f32 1.442695, %v881_v29  ;;  %924 = vadd.xlane.f32.xlu1 %v923_v27  ;;  %v889_v43 = vmul.f32 1.442695, %v876_v41 }
 0x3c9   : > { %1747 = vpow2.f32 %v899_v30 }
 0x3cc   : > { %v850_v31 = vpop.xlane.xlu1 %849  ;;  %v871_v32 = vpop.xlane.xlu2 %870 }
 0x3cd   : > { %v878_v33 = vsub.f32 %v829_v62, %v850_v31  ;;  %v885_v34 = vsub.f32 %v836_v61, %v871_v32  ;;  %v1115_v35 = vpop.permute.xlu0 %1114 }
 0x3ce   : > { %v1124_v36 = vsel %vm1002_vm12, %v1115_v35, 0 }
 0x3cf   : > { %v893_v37 = vmul.f32 1.442695, %v878_v33  ;;  %v907_v38 = vmul.f32 1.442695, %v885_v34  ;;  %1132 = vmatpush.bf16.msra.mxu0 %v1124_v36  ;;  %v2081_v39 = vpop.eup %1747 }
 0x3d0   : > { %v929_v42 = vsel %vm838_vm14, %v2081_v39, 0.0 }
 0x3d1   : > { %1749 = vpow2.f32 %v893_v37  ;;  %930 = vadd.xlane.f32.xlu0 %v929_v42 }
 0x3d2   : > { %1751 = vpow2.f32 %v907_v38 }
 0x3d3   : > { %1753 = vpow2.f32 %v889_v43 }
 0x3d4   : > { %v862_v44 = vpop.xlane.xlu1 %861  ;;  %v1073_v45 = vpop.permute.xlu2 %1072 }
 0x3d5   : > { %v882_v46 = vsub.f32 %v833_v5, %v862_v44  ;;  %1093 = vmatpush.bf16.msrb.mxu3 %v1073_v45 }
 0x3d7   : > { %v2086_v47 = vpop.eup %1749  ;;  %v901_v48 = vmul.f32 1.442695, %v882_v46 }
 0x3d8   : > { %v2088_v50 = vpop.eup %1751  ;;  %v920_v49 = vsel %vm838_vm14, %v2086_v47, 0.0 }
 0x3d9   : > { %1755 = vpow2.f32 %v901_v48  ;;  %921 = vadd.xlane.f32.xlu2 %v920_v49  ;;  %v941_v51 = vsel %vm838_vm14, %v2088_v50, 0.0  ;;  %v2095_v55 = vpop.eup %1753 }
 0x3da   : > { %942 = vadd.xlane.f32.xlu0 %v941_v51  ;;  %v914_v62 = vsel %vm838_vm14, %v2095_v55, 0.0 }
 0x3dc   : > { %v856_v53 = vpop.xlane.xlu1 %855 }
 0x3dd   : > { %v880_v54 = vsub.f32 %v2053_v8, %v856_v53 }
 0x3df   : > { %v2097_v56 = vpop.eup %1755  ;;  %v897_v58 = vmul.f32 1.442695, %v880_v54 }
 0x3e0   : > { %1112 = vrot.lane.b32.xlu1 %v1967_v60, %s1819_s15  ;;  %v932_v61 = vsel %vm838_vm14, %v2097_v56, 0.0 }
 0x3e1   : > { %1757 = vpow2.f32 %v897_v58  ;;  %933 = vadd.xlane.f32.xlu2 %v932_v61 }
 0x3e2   : > { %915 = vadd.xlane.f32.xlu0 %v914_v62  ;;  %1759 = vpow2.f32 %v887_v1 }
 0x3e7   : > { %v2106_v2 = vpop.eup %1757 }
 0x3e8   : > { %v926_v3 = vsel %vm838_vm14, %v2106_v2, 0.0  ;;  %v2112_v60 = vpop.eup %1759 }
 0x3e9   : > { %846 = vmax.xlane.f32.xlu2 %v845_v40  ;;  %v911_v4 = vsel %vm838_vm14, %v2112_v60, 0.0 }
 0x3ea   : > { %927 = vadd.xlane.f32.xlu0 %v926_v3 }
 0x3f1   : > { %912 = vadd.xlane.f32.xlu2 %v911_v4 }
 0x3f7   : > { %v874_v5 = vpop.xlane.xlu0 %873 }
 0x3f8   : > { %v886_v8 = vsub.f32 %v2061_v10, %v874_v5 }
 0x3fa   : > { %v909_v52 = vmul.f32 1.442695, %v886_v8 }
 0x3fe   : > { %991 = vrot.lane.b32.xlu0 %v1950_v19, %s1819_s15 }
 0x3ff   : > { %v865_v6 = vpop.xlane.xlu0 %864 }
 0x400   : > { %v883_v7 = vsub.f32 %v2067_v14, %v865_v6 }
 0x402   : > { %v903_v9 = vmul.f32 1.442695, %v883_v7 }
 0x404   : > { %1761 = vpow2.f32 %v903_v9 }
 0x405   : > { %1763 = vpow2.f32 %v909_v52 }
 0x409   : > { %993 = vrot.lane.b32.xlu2 %v1975_v63, %s1819_s15 }
 0x40a   : > { %v2122_v11 = vpop.eup %1761 }
 0x40b   : > { %v935_v13 = vsel %vm838_vm14, %v2122_v11, 0.0  ;;  %v2126_v15 = vpop.eup %1763 }
 0x40c   : > { %936 = vadd.xlane.f32.xlu1 %v935_v13  ;;  %v944_v19 = vsel %vm838_vm14, %v2126_v15, 0.0 }
 0x414   : > { %945 = vadd.xlane.f32.xlu1 %v944_v19 }
 0x42c   : > { %v940_v10 = vpop.xlane.xlu1 %939 }
 0x43a   : > { %v925_v14 = vpop.xlane.xlu1 %924 }
 0x43b   : > { %1765 = vrcp.f32 %v925_v14 }
 0x43c   : > { %1767 = vrcp.f32 %v940_v10 }
 0x441   : > { %v1766_v63 = vpop.eup %1765 }
 0x442   : > { %v1768_v20 = vpop.eup %1767  ;;  %v963_v21 = vmul.f32 %v1766_v63, %v2076_v28 }
 0x443   : > { %v968_v22 = vmul.f32 %v1768_v20, %v2072_v18 }
 0x444   : > { %v931_v16 = vpop.xlane.xlu0 %930  ;;  %v975_v26 = vpack.c.bf16 %v963_v21, %v963_v21 }
 0x445   : > { %v980_v31 = vpack.c.bf16 %v968_v22, %v968_v22 }
 0x446   : > { %v1028_v36 = vunpack.c.l.b16 %v975_v26 }
 0x447   : > { %v1107_v37 = vunpack.c.l.b16 %v980_v31 }
 0x44c   : > { %v922_v59 = vpop.xlane.xlu2 %921 }
 0x44d   : > { %v943_v17 = vpop.xlane.xlu0 %942  ;;  %1769 = vrcp.f32 %v922_v59 }
 0x44e   : > { %1771 = vrcp.f32 %v943_v17 }
 0x44f   : > { %1773 = vrcp.f32 %v931_v16 }
 0x452   : > { %v1113_v23 = vpop.permute.xlu1 %1112 }
 0x453   : > { %v1770_v24 = vpop.eup %1769  ;;  %1133 = vmatpush.bf16.msra.mxu0 %v1113_v23 }
 0x454   : > { %v1772_v25 = vpop.eup %1771  ;;  %v962_v29 = vmul.f32 %v1770_v24, %v2086_v47  ;;  %v934_v27 = vpop.xlane.xlu2 %933 }
 0x455   : > { %v1774_v30 = vpop.eup %1773  ;;  %v969_v32 = vmul.f32 %v1772_v25, %v2088_v50  ;;  %v916_v33 = vpop.xlane.xlu0 %915  ;;  %1775 = vrcp.f32 %v934_v27 }
 0x456   : > { %v974_v34 = vpack.c.bf16 %v962_v29, %v962_v29  ;;  %v965_v28 = vmul.f32 %v1774_v30, %v2081_v39 }
 0x457   : > { %v981_v35 = vpack.c.bf16 %v969_v32, %v969_v32 }
 0x458   : > { %v1027_v18 = vunpack.c.l.b16 %v974_v34  ;;  %v977_v44 = vpack.c.bf16 %v965_v28, %v965_v28 }
 0x459   : > { %v1108_v38 = vunpack.c.l.b16 %v981_v35 }
 0x45a   : > { %v1030_v41 = vpack.c.b16 %v1028_v36, %v1027_v18  ;;  %v1067_v49 = vunpack.c.l.b16 %v977_v44  ;;  %v1686_v44 = vld [vmem:[%s2306_s5] sm:$0xff] }
 0x45b   : > { %v1776_v42 = vpop.eup %1775  ;;  %v1110_v43 = vpack.c.b16 %v1108_v38, %v1107_v37 }
 0x45c   : > { %v966_v45 = vmul.f32 %v1776_v42, %v2097_v56  ;;  %1635 = vmatmul.msk.bf16.vlgmr.msrb.gmra.mxu2 %vm838_vm14, %v1030_v41  ;;  %v847_v46 = vpop.xlane.xlu2 %846 }
 0x45d   : > { %1639 = vmatmul.msk.bf16.vlgmr.msra.gmra.mxu0 %vm838_vm14, %v1110_v43  ;;  %v928_v47 = vpop.xlane.xlu0 %927  ;;  %v877_v48 = vsub.f32 %v2042_v0, %v847_v46  ;;  %v1687_v43 = vld [vmem:[%s2306_s5 + $0x8] sm:$0xff] }
 0x45e   : > { %v978_v50 = vpack.c.bf16 %v966_v45, %v966_v45  ;;  %1777 = vrcp.f32 %v928_v47 }
 0x45f   : > { %1779 = vrcp.f32 %v916_v33  ;;  %v891_v39 = vmul.f32 1.442695, %v877_v48 }
 0x460   : > { %v1068_v51 = vunpack.c.l.b16 %v978_v50 }
 0x461   : > { %1781 = vpow2.f32 %v891_v39 }
 0x462   : > { %v1070_v53 = vpack.c.b16 %v1068_v51, %v1067_v49 }
 0x464   : > { %v1778_v54 = vpop.eup %1777  ;;  %1637 = vmatmul.msk.bf16.vlgmr.msrb.gmra.mxu3 %vm838_vm14, %v1070_v53  ;;  %v913_v56 = vpop.xlane.xlu2 %912 }
 0x465   : > { %v1780_v57 = vpop.eup %1779  ;;  %1783 = vrcp.f32 %v913_v56  ;;  %v964_v58 = vmul.f32 %v1778_v54, %v2106_v2 }
 0x466   : > { %v960_v0 = vmul.f32 %v1780_v57, %v2095_v55 }
 0x467   : > { %v1782_v61 = vpop.eup %1781  ;;  %v976_v62 = vpack.c.bf16 %v964_v58, %v964_v58 }
 0x468   : > { %v917_v1 = vsel %vm838_vm14, %v1782_v61, 0.0  ;;  %v972_v5 = vpack.c.bf16 %v960_v0, %v960_v0 }
 0x469   : > { %918 = vadd.xlane.f32.xlu1 %v917_v1  ;;  %v1029_v40 = vunpack.c.l.b16 %v976_v62  ;;  %v1730_v1 = vld [vmem:[%s2307_s6] ss:$0 sm:$0xff] }
 0x46a   : > { %v987_v2 = vunpack.c.l.b16 %v972_v5 }
 0x46b   : > { %v1784_v3 = vpop.eup %1783  ;;  %v1031_v4 = vpack.c.b16 %v1029_v40, %v1029_v40 }
 0x46c   : > { %v959_v6 = vmul.f32 %v1784_v3, %v2112_v60  ;;  %v994_v7 = vpop.permute.xlu2 %993 }
 0x46d   : > { %1636 = vmatmul.msk.bf16.gmra.mxu2 %vm838_vm14, %v1031_v4  ;;  %v1004_v8 = vsel %vm1002_vm12, %v994_v7, 0  ;;  %v1803_v4 = vld [vmem:[%s1909_s30] sm:$0xff] }
 0x46e   : > { %v971_v9 = vpack.c.bf16 %v959_v6, %v959_v6  ;;  %1012 = vmatpush.bf16.msrb.mxu1 %v1004_v8 }
 0x470   : > { %v986_v52 = vunpack.c.l.b16 %v971_v9  ;;  %v992_v13 = vpop.permute.xlu0 %991  ;;  %v1804_v9 = vld [vmem:[%s1909_s30 + $0x8] sm:$0xff] }
 0x472   : > { %1013 = vmatpush.bf16.msrb.mxu1 %v992_v13  ;;  %v989_v55 = vpack.c.b16 %v987_v2, %v986_v52 }
 0x475   : > { %1633 = vmatmul.msk.bf16.vlgmr.msrb.gmra.mxu1 %vm838_vm14, %v989_v55 }
 0x476   : > { %1227 = vmatpush.bf16.msra.mxu1 %v1687_v43 }
 0x47a   : > { %1228 = vmatpush.bf16.msra.mxu1 %v1686_v44 }
 0x47f   : > { %v937_v19 = vpop.xlane.xlu1 %936 }
 0x480   : > { %1785 = vrcp.f32 %v937_v19  ;;  %v1805_v19 = vld [vmem:[%s1909_s30 + $0x10] sm:$0xff] }
 0x486   : > { %v1786_v10 = vpop.eup %1785 }
 0x487   : > { %v946_v14 = vpop.xlane.xlu1 %945  ;;  %v967_v60 = vmul.f32 %v1786_v10, %v2122_v11 }
 0x488   : > { %1787 = vrcp.f32 %v946_v14 }
 0x489   : > { %v979_v16 = vpack.c.bf16 %v967_v60, %v967_v60 }
 0x48b   : > { %v1069_v59 = vunpack.c.l.b16 %v979_v16 }
 0x48d   : > { %v1071_v63 = vpack.c.b16 %v1069_v59, %v1069_v59 }
 0x48e   : > { %v1788_v17 = vpop.eup %1787 }
 0x48f   : > { %1638 = vmatmul.msk.bf16.gmra.mxu3 %vm838_vm14, %v1071_v63  ;;  %v970_v20 = vmul.f32 %v1788_v17, %v2126_v15 }
 0x491   : > { %v982_v21 = vpack.c.bf16 %v970_v20, %v970_v20 }
 0x493   : > { %v1109_v22 = vunpack.c.l.b16 %v982_v21 }
 0x495   : > { %v1111_v23 = vpack.c.b16 %v1109_v22, %v1109_v22 }
 0x497   : > { %1640 = vmatmul.msk.bf16.gmra.mxu0 %vm838_vm14, %v1111_v23 }
 0x4da   : > { %v1135_v25 = vpop.f32.mrf.mxu0 }
 0x4dc   : > { %v919_v24 = vpop.xlane.xlu1 %918 }
 0x4dd   : > { %1789 = vrcp.f32 %v919_v24 }
 0x4df   : > { %v1055_v26 = vpop.f32.mrf.mxu2 }
 0x4e0   : > { %1150 = vrot.lane.b32.xlu1 %v1055_v26, %s1820_s16 }
 0x4e2   : > { %v1137_v32 = vpop.f32.mrf.mxu0 }
 0x4e3   : > { %v1790_v11 = vpop.eup %1789 }
 0x4e4   : > { %v961_v29 = vmul.f32 %v1790_v11, %v1782_v61 }
 0x4e6   : > { %v973_v27 = vpack.c.bf16 %v961_v29, %v961_v29 }
 0x4e7   : > { %v1057_v30 = vpop.f32.mrf.mxu2  ;;  %v1095_v31 = vpop.f32.mrf.mxu3 }
 0x4e8   : > { %1152 = vrot.lane.b32.xlu0 %v1057_v30, %s1820_s16  ;;  %1166 = vrot.lane.b32.xlu2 %v1095_v31, %s1821_s17  ;;  %v988_v15 = vunpack.c.l.b16 %v973_v27  ;;  %v1689_v31 = vld [vmem:[%s2310_s9 + $0x8] sm:$0xff] }
 0x4e9   : > { %1184 = vrot.lane.b32.xlu1 %v1137_v32, %s1822_s18  ;;  %1349 = vmatpush.bf16.msra.mxu2 %v1689_v31 }
 0x4ea   : > { %v990_v33 = vpack.c.b16 %v988_v15, %v988_v15 }
 0x4ec   : > { %1634 = vmatmul.msk.bf16.gmra.mxu1 %vm838_vm14, %v990_v33 }
 0x4ef   : > { %v1097_v34 = vpop.f32.mrf.mxu3 }
 0x4f0   : > { %v1060_v35 = vpop.f32.mrf.mxu2  ;;  %1182 = vrot.lane.b32.xlu2 %v1135_v25, %s1822_s18  ;;  %1168 = vrot.lane.b32.xlu0 %v1097_v34, %s1821_s17  ;;  %v1688_v34 = vld [vmem:[%s2310_s9] sm:$0xff] }
 0x4f1   : > { %1350 = vmatpush.bf16.msra.mxu2 %v1688_v34 }
 0x4f2   : > { %v1015_v36 = vpop.f32.mrf.mxu1 }
 0x4f3   : > { %1144 = vst.msk [vmem:[#allocation2] sm:$0xff] %vm654_vm11, %v1015_v36 }
 0x4f8   : > { %v1062_v28 = vpop.f32.mrf.mxu2  ;;  %1154 = vrot.lane.b32.xlu0 %v1060_v35, %s1820_s16 }
 0x4fa   : > { %v1017_v18 = vpop.f32.mrf.mxu1 }
 0x4fb   : > { %1145 = vst.msk [vmem:[#allocation2 + $0x8] sm:$0xff] %vm654_vm11, %v1017_v18 }
 0x512   : > { %v1100_v37 = vpop.f32.mrf.mxu3 }
 0x513   : > { %1170 = vrot.lane.b32.xlu2 %v1100_v37, %s1821_s17 }
 0x514   : > { %v1140_v38 = vpop.f32.mrf.mxu0 }
 0x515   : > { %1186 = vrot.lane.b32.xlu1 %v1140_v38, %s1822_s18 }
 0x51a   : > { %v1102_v41 = vpop.f32.mrf.mxu3 }
 0x51c   : > { %v1142_v42 = vpop.f32.mrf.mxu0 }
 0x542   : > { %v1167_v45 = vpop.permute.xlu2 %1166 }
 0x54a   : > { %v1183_v47 = vpop.permute.xlu2 %1182 }
 0x552   : > { %v1151_v46 = vpop.permute.xlu1 %1150 }
 0x553   : > { %1160 = vst.msk [vmem:[#allocation2] sm:$0xff] %vm1159_vm15, %v1151_v46 }
 0x554   : > { %1176 = vst.msk [vmem:[#allocation2] sm:$0xff] %vm1175_vm1, %v1167_v45 }
 0x555   : > { %1192 = vst.msk [vmem:[#allocation2] sm:$0xff] %vm1191_vm2, %v1183_v47 }
 0x55a   : > { %v1153_v48 = vpop.permute.xlu0 %1152 }
 0x55b   : > { %1161 = vst.msk [vmem:[#allocation2 + $0x8] sm:$0xff] %vm1159_vm15, %v1153_v48  ;;  %v1185_v39 = vpop.permute.xlu1 %1184 }
 0x55c   : > { %v1195_v53 = vld [vmem:[#allocation2] sm:$0xff] }
 0x562   : > { %v1169_v50 = vpop.permute.xlu0 %1168 }
 0x563   : > { %1177 = vst.msk [vmem:[#allocation2 + $0x8] sm:$0xff] %vm1175_vm1, %v1169_v50 }
 0x564   : > { %1193 = vst.msk [vmem:[#allocation2 + $0x8] sm:$0xff] %vm1191_vm2, %v1185_v39  ;;  %v1731_v39 = vld [vmem:[%s2308_s7] ss:$0 sm:$0xff] }
 0x569   : > { %v1020_v49 = vpop.f32.mrf.mxu1 }
 0x56a   : > { %1146 = vst.msk [vmem:[#allocation2 + $0x10] sm:$0xff] %vm654_vm11, %v1020_v49  ;;  %v1155_v51 = vpop.permute.xlu0 %1154 }
 0x56b   : > { %1162 = vst.msk [vmem:[#allocation2 + $0x10] sm:$0xff] %vm1159_vm15, %v1155_v51  ;;  %v1196_v54 = vld [vmem:[#allocation2 + $0x8] sm:$0xff] }
 0x56c   : > { %v1198_v56 = vpack.c.bf16 %v1196_v54, %v1195_v53  ;;  %v1732_v54 = vld [vmem:[%s2309_s8] ss:$0 sm:$0xff] }
 0x56d   : > { %v1171_v57 = vpop.permute.xlu2 %1170 }
 0x56e   : > { %1649 = vmatmul.msk.bf16.vlgmr.msra.gmra.mxu1 %vm473_vm0, %v1198_v56  ;;  %1178 = vst.msk [vmem:[#allocation2 + $0x10] sm:$0xff] %vm1175_vm1, %v1171_v57 }
 0x571   : > { %v1022_v58 = vpop.f32.mrf.mxu1 }
 0x587   : > { %v1187_v61 = vpop.permute.xlu1 %1186 }
 0x588   : > { %1194 = vst.msk [vmem:[#allocation2 + $0x10] sm:$0xff] %vm1191_vm2, %v1187_v61 }
 0x58f   : > { %v1197_v62 = vld [vmem:[#allocation2 + $0x10] sm:$0xff] }
 0x590   : > { %v1199_v0 = vpack.c.bf16 %v1197_v62, %v1197_v62 }
 0x592   : > { %1650 = vmatmul.msk.bf16.gmra.mxu1 %vm473_vm0, %v1199_v0 }
 0x5eb   : > { %v1230_v40 = vpop.f32.mrf.mxu1 }
 0x5ec   : > { %v1231_v3 = vadd.f32 %v1730_v1, %v1230_v40 }
 0x5ee   : > { %v2176_v5 = vadd.f32 %v1803_v4, %v1231_v3 }
 0x5f0   : > { %v1242_v6 = vsel %vm473_vm0, %v2176_v5, 0.0 }
 0x5f1   : > { %1243 = vadd.xlane.f32.xlu0 %v1242_v6 }
 0x5f3   : > { %v1232_v7 = vpop.f32.mrf.mxu1 }
 0x5f4   : > { %v1233_v8 = vadd.f32 %v1730_v1, %v1232_v7 }
 0x5f6   : > { %v2181_v2 = vadd.f32 %v1804_v9, %v1233_v8 }
 0x5f8   : > { %v1245_v52 = vsel %vm473_vm0, %v2181_v2, 0.0 }
 0x5f9   : > { %1246 = vadd.xlane.f32.xlu2 %v1245_v52 }
 0x60f   : > { %v1235_v13 = vpop.f32.mrf.mxu1 }
 0x610   : > { %v1236_v55 = vadd.f32 %v1730_v1, %v1235_v13 }
 0x612   : > { %v2186_v10 = vadd.f32 %v1805_v19, %v1236_v55 }
 0x614   : > { %v1248_v14 = vsel %vm473_vm0, %v2186_v10, 0.0 }
 0x615   : > { %1249 = vadd.xlane.f32.xlu1 %v1248_v14 }
 0x617   : > { %v1237_v60 = vpop.f32.mrf.mxu1 }
 0x664   : > { %v1244_v16 = vpop.xlane.xlu0 %1243 }
 0x665   : > { %v1251_v59 = vmul.f32 %v1244_v16, %v1917_v12 }
 0x667   : > { %v1254_v63 = vsub.f32 %v2176_v5, %v1251_v59 }
 0x669   : > { %v1257_v17 = vmul.f32 %v1254_v63, %v1254_v63 }
 0x66b   : > { %v1260_v20 = vsel %vm473_vm0, %v1257_v17, 0.0 }
 0x66c   : > { %1261 = vadd.xlane.f32.xlu0 %v1260_v20  ;;  %v1247_v21 = vpop.xlane.xlu2 %1246 }
 0x66d   : > { %v1252_v22 = vmul.f32 %v1247_v21, %v1917_v12 }
 0x66f   : > { %v1255_v23 = vsub.f32 %v2181_v2, %v1252_v22 }
 0x671   : > { %v1258_v24 = vmul.f32 %v1255_v23, %v1255_v23 }
 0x673   : > { %v1263_v25 = vsel %vm473_vm0, %v1258_v24, 0.0 }
 0x674   : > { %1264 = vadd.xlane.f32.xlu2 %v1263_v25 }
 0x688   : > { %v1250_v26 = vpop.xlane.xlu1 %1249 }
 0x689   : > { %v1253_v11 = vmul.f32 %v1250_v26, %v1917_v12 }
 0x68b   : > { %v1256_v29 = vsub.f32 %v2186_v10, %v1253_v11 }
 0x68d   : > { %v1259_v27 = vmul.f32 %v1256_v29, %v1256_v29 }
 0x68f   : > { %v1266_v30 = vsel %vm473_vm0, %v1259_v27, 0.0 }
 0x690   : > { %1267 = vadd.xlane.f32.xlu1 %v1266_v30 }
 0x6df   : > { %v1262_v32 = vpop.xlane.xlu0 %1261 }
 0x6e0   : > { %v1269_v15 = vmul.f32 %v1262_v32, %v1917_v12 }
 0x6e2   : > { %v1272_v33 = vadd.f32 1e-06, %v1269_v15 }
 0x6e4   : > { %1791 = vrsqrt.f32 %v1272_v33  ;;  %vm1281_vm4 = vweird.f32 %v1272_v33 }
 0x6e7   : > { %v1265_v35 = vpop.xlane.xlu2 %1264 }
 0x6e8   : > { %v1270_v36 = vmul.f32 %v1265_v35, %v1917_v12 }
 0x6ea   : > { %v1792_v28 = vpop.eup %1791  ;;  %v1273_v18 = vadd.f32 1e-06, %v1270_v36 }
 0x6eb   : > { %v1276_v37 = vmul.f32 %v1792_v28, %v1272_v33  ;;  %vm1282_vm3 = vweird.f32 %v1792_v28  ;;  %v1693_v33 = vld [vmem:[%s2312_s11 + $0x18] sm:$0xff] }
 0x6ec   : > { %1793 = vrsqrt.f32 %v1273_v18  ;;  %vm1283_vm5 = vmor %vm1281_vm4, %vm1282_vm3  ;;  %vm1291_vm7 = vweird.f32 %v1273_v18  ;;  %1533 = vmatpush.bf16.msra.mxu3 %v1693_v33 }
 0x6ed   : > { %v1277_v38 = vmul.f32 %v1792_v28, %v1276_v37 }
 0x6ef   : > { %v1278_v41 = vmul.f32 0.5, %v1277_v38 }
 0x6f1   : > { %v1279_v42 = vsub.f32 1.5, %v1278_v41  ;;  %v1692_v41 = vld [vmem:[%s2312_s11 + $0x10] sm:$0xff] }
 0x6f2   : > { %v1794_v43 = vpop.eup %1793  ;;  %1534 = vmatpush.bf16.msra.mxu3 %v1692_v41 }
 0x6f3   : > { %v1280_v44 = vmul.f32 %v1792_v28, %v1279_v42  ;;  %v1286_v45 = vmul.f32 %v1794_v43, %v1273_v18  ;;  %vm1292_vm6 = vweird.f32 %v1794_v43 }
 0x6f4   : > { %vm1293_vm8 = vmor %vm1291_vm7, %vm1292_vm6 }
 0x6f5   : > { %v1287_v46 = vmul.f32 %v1794_v43, %v1286_v45  ;;  %v1284_v47 = vsel %vm1283_vm5, %v1792_v28, %v1280_v44  ;;  %vm1522_vm5 = vcmask 523264  }
 0x6f6   : > { %v1305_v49 = vmul.f32 %v1284_v47, %v1254_v63 }
 0x6f7   : > { %v1288_v48 = vmul.f32 0.5, %v1287_v46 }
 0x6f8   : > { %v1311_v56 = vmul.f32 %v1731_v39, %v1305_v49 }
 0x6f9   : > { %v1289_v50 = vsub.f32 1.5, %v1288_v48 }
 0x6fa   : > { %v1317_v61 = vadd.f32 %v1732_v54, %v1311_v56 }
 0x6fb   : > { %v1290_v51 = vmul.f32 %v1794_v43, %v1289_v50  ;;  %v1691_v50 = vld [vmem:[%s2312_s11 + $0x8] sm:$0xff] }
 0x6fc   : > { %1535 = vmatpush.bf16.msra.mxu3 %v1691_v50 }
 0x6fd   : > { %v1294_v53 = vsel %vm1293_vm8, %v1794_v43, %v1290_v51 }
 0x6fe   : > { %v1306_v57 = vmul.f32 %v1294_v53, %v1255_v23 }
 0x700   : > { %v1312_v58 = vmul.f32 %v1731_v39, %v1306_v57  ;;  %v1690_v57 = vld [vmem:[%s2312_s11] sm:$0xff] }
 0x701   : > { %1536 = vmatpush.bf16.msra.mxu3 %v1690_v57 }
 0x702   : > { %v1318_v62 = vadd.f32 %v1732_v54, %v1312_v58 }
 0x703   : > { %v1268_v0 = vpop.xlane.xlu1 %1267 }
 0x704   : > { %v1320_v1 = vpack.c.bf16 %v1318_v62, %v1317_v61  ;;  %v1271_v40 = vmul.f32 %v1268_v0, %v1917_v12  ;;  %v1733_v12 = vld [vmem:[%s2311_s10] ss:$0 sm:$0xff] }
 0x706   : > { %1659 = vmatmul.msk.bf16.vlgmr.msra.gmra.mxu2 %vm473_vm0, %v1320_v1  ;;  %v1274_v3 = vadd.f32 1e-06, %v1271_v40 }
 0x708   : > { %1795 = vrsqrt.f32 %v1274_v3  ;;  %vm1301_vm10 = vweird.f32 %v1274_v3 }
 0x70e   : > { %v1796_v4 = vpop.eup %1795 }
 0x70f   : > { %v1296_v6 = vmul.f32 %v1796_v4, %v1274_v3  ;;  %vm1302_vm9 = vweird.f32 %v1796_v4 }
 0x710   : > { %vm1303_vm11 = vmor %vm1301_vm10, %vm1302_vm9 }
 0x711   : > { %v1297_v7 = vmul.f32 %v1796_v4, %v1296_v6 }
 0x713   : > { %v1298_v8 = vmul.f32 0.5, %v1297_v7 }
 0x715   : > { %v1299_v9 = vsub.f32 1.5, %v1298_v8 }
 0x717   : > { %v1300_v52 = vmul.f32 %v1796_v4, %v1299_v9 }
 0x719   : > { %v1304_v13 = vsel %vm1303_vm11, %v1796_v4, %v1300_v52 }
 0x71a   : > { %v1307_v55 = vmul.f32 %v1304_v13, %v1256_v29 }
 0x71c   : > { %v1313_v19 = vmul.f32 %v1731_v39, %v1307_v55 }
 0x71e   : > { %v1319_v14 = vadd.f32 %v1732_v54, %v1313_v19 }
 0x720   : > { %v1321_v60 = vpack.c.bf16 %v1319_v14, %v1319_v14 }
 0x722   : > { %1660 = vmatmul.msk.bf16.gmra.mxu2 %vm473_vm0, %v1321_v60 }
 0x789   : > { %v1352_v16 = vpop.f32.mrf.mxu2 }
 0x78a   : > { %v2219_v59 = vadd.f32 %v1733_v12, %v1352_v16 }
 0x78c   : > { %v2222_v63 = vmul.f32 0.70710677, %v2219_v59 }
 0x78e   : > { %v1367_v17 = vmul.f32 %v2222_v63, %v2222_v63 }
 0x790   : > { %v1368_v20 = vmin.f32 %v1367_v17, 16.0 }
 0x791   : > { %v1354_v21 = vpop.f32.mrf.mxu2 }
 0x792   : > { %v1369_v22 = vmul.f32 2.1237322e-06, %v1368_v20  ;;  %v1380_v23 = vmul.f32 3.8918573e-05, %v1368_v20  ;;  %v2226_v24 = vadd.f32 %v1733_v12, %v1354_v21 }
 0x794   : > { %v1370_v25 = vadd.f32 0.00028619796, %v1369_v22  ;;  %v1381_v26 = vadd.f32 0.001143296, %v1380_v23  ;;  %v2229_v11 = vmul.f32 0.70710677, %v2226_v24 }
 0x796   : > { %v1382_v29 = vmul.f32 %v1381_v26, %v1368_v20  ;;  %v1407_v27 = vmul.f32 %v2229_v11, %v2229_v11  ;;  %v1371_v30 = vmul.f32 %v1370_v25, %v1368_v20 }
 0x798   : > { %v1383_v31 = vadd.f32 0.014752088, %v1382_v29  ;;  %v2233_v32 = vmin.f32 %v1407_v27, 16.0  ;;  %v1372_v36 = vadd.f32 0.0036580483, %v1371_v30 }
 0x79a   : > { %v1384_v15 = vmul.f32 %v1383_v31, %v1368_v20  ;;  %v1409_v34 = vmul.f32 2.1237322e-06, %v2233_v32  ;;  %v1420_v35 = vmul.f32 3.8918573e-05, %v2233_v32  ;;  %v1373_v44 = vmul.f32 %v1372_v36, %v1368_v20 }
 0x79c   : > { %v1385_v28 = vadd.f32 0.112945676, %v1384_v15  ;;  %v1410_v18 = vadd.f32 0.00028619796, %v1409_v34  ;;  %v1421_v37 = vadd.f32 0.001143296, %v1420_v35 }
 0x79d   : > { %v1374_v49 = vadd.f32 0.05243302, %v1373_v44 }
 0x79e   : > { %v1386_v38 = vmul.f32 %v1385_v28, %v1368_v20  ;;  %v1411_v42 = vmul.f32 %v1410_v18, %v2233_v32  ;;  %v1422_v43 = vmul.f32 %v1421_v37, %v2233_v32 }
 0x79f   : > { %v1375_v62 = vmul.f32 %v1374_v49, %v1368_v20 }
 0x7a0   : > { %v1387_v45 = vadd.f32 0.4994258, %v1386_v38  ;;  %v1412_v46 = vadd.f32 0.0036580483, %v1411_v42  ;;  %v1423_v47 = vadd.f32 0.014752088, %v1422_v43 }
 0x7a1   : > { %v1376_v6 = vadd.f32 0.18741608, %v1375_v62 }
 0x7a2   : > { %v1388_v48 = vmul.f32 %v1387_v45, %v1368_v20  ;;  %v1424_v39 = vmul.f32 %v1423_v47, %v2233_v32  ;;  %v1413_v53 = vmul.f32 %v1412_v46, %v2233_v32 }
 0x7a3   : > { %v1377_v14 = vmul.f32 %v1376_v6, %v1368_v20 }
 0x7a4   : > { %v1389_v51 = vadd.f32 1.0, %v1388_v48  ;;  %v1425_v54 = vadd.f32 0.112945676, %v1424_v39  ;;  %v1414_v0 = vadd.f32 0.05243302, %v1413_v53 }
 0x7a5   : > { %v1357_v56 = vpop.f32.mrf.mxu2  ;;  %v1378_v29 = vadd.f32 1.1283791, %v1377_v14 }
 0x7a6   : > { %1797 = vrcp.f32 %v1389_v51  ;;  %v1426_v58 = vmul.f32 %v1425_v54, %v2233_v32  ;;  %v2254_v61 = vadd.f32 %v1733_v12, %v1357_v56  ;;  %v1415_v9 = vmul.f32 %v1414_v0, %v2233_v32 }
 0x7a7   : > { %v1401_v60 = vand.u32 2147483648, %v1389_v51  ;;  %v1399_v22 = vand.u32 2147483647, %v1389_v51  ;;  %vm1395_vm13 = vweird.f32 %v1389_v51  ;;  %v1379_v28 = vmul.f32 %v1378_v29, %v2222_v63 }
 0x7a8   : > { %v1427_v1 = vadd.f32 0.4994258, %v1426_v58  ;;  %v2257_v40 = vmul.f32 0.70710677, %v2254_v61  ;;  %v1416_v17 = vadd.f32 0.18741608, %v1415_v9 }
 0x7a9   : > { %v1402_v20 = vor.u32 1.1754944e-38, %v1401_v60  ;;  %vm1400_vm15 = vcmp.eq.f32.partialorder %v1399_v22, 8.507059e+37 }
 0x7aa   : > { %v1428_v3 = vmul.f32 %v1427_v1, %v2233_v32  ;;  %v1447_v7 = vmul.f32 %v2257_v40, %v2257_v40  ;;  %v1417_v15 = vmul.f32 %v1416_v17, %v2233_v32  ;;  %v1361_v1 = vmul.f32 0.5, %v2219_v59 }
 0x7ac   : > { %v1798_v4 = vpop.eup %1797  ;;  %v1429_v52 = vadd.f32 1.0, %v1428_v3  ;;  %v2263_v13 = vmin.f32 %v1447_v7, 16.0  ;;  %v1418_v38 = vadd.f32 1.1283791, %v1417_v15  ;;  %v1362_v3 = vmul.f32 0.5, %v2226_v24 }
 0x7ad   : > { %v1391_v8 = vmul.f32 %v1798_v4, %v1389_v51  ;;  %v1359_v55 = vpop.f32.mrf.mxu2  ;;  %vm1396_vm12 = vweird.f32 %v1798_v4 }
 0x7ae   : > { %1799 = vrcp.f32 %v1429_v52  ;;  %v1449_v12 = vmul.f32 2.1237322e-06, %v2263_v13  ;;  %v1460_v21 = vmul.f32 3.8918573e-05, %v2263_v13  ;;  %vm1397_vm14 = vmor %vm1395_vm13, %vm1396_vm12  ;;  %v1441_v41 = vand.u32 2147483648, %v1429_v52 }
 0x7af   : > { %v1392_v19 = vsub.f32 1.0, %v1391_v8  ;;  %v1439_v45 = vand.u32 2147483647, %v1429_v52  ;;  %vm1435_vm2 = vweird.f32 %v1429_v52  ;;  %v1419_v39 = vmul.f32 %v1418_v38, %v2229_v11 }
 0x7b0   : > { %v1450_v23 = vadd.f32 0.00028619796, %v1449_v12  ;;  %v1461_v26 = vadd.f32 0.001143296, %v1460_v21  ;;  %v1442_v48 = vor.u32 1.1754944e-38, %v1441_v41 }
 0x7b1   : > { %v1393_v16 = vmul.f32 %v1798_v4, %v1392_v19  ;;  %vm1440_vm4 = vcmp.eq.f32.partialorder %v1439_v45, 8.507059e+37 }
 0x7b2   : > { %v1451_v27 = vmul.f32 %v1450_v23, %v2263_v13  ;;  %v1462_v33 = vmul.f32 %v1461_v26, %v2263_v13 }
 0x7b3   : > { %v1394_v25 = vadd.f32 %v1798_v4, %v1393_v16 }
 0x7b4   : > { %v1800_v30 = vpop.eup %1799  ;;  %v1463_v36 = vadd.f32 0.014752088, %v1462_v33  ;;  %v1452_v37 = vadd.f32 0.0036580483, %v1451_v27 }
 0x7b5   : > { %v1398_v31 = vsel %vm1397_vm14, %v1798_v4, %v1394_v25  ;;  %v1431_v34 = vmul.f32 %v1800_v30, %v1429_v52  ;;  %vm1436_vm1 = vweird.f32 %v1800_v30 }
 0x7b6   : > { %v1403_v35 = vsel %vm1400_vm15, %v1402_v20, %v1398_v31  ;;  %v1464_v42 = vmul.f32 %v1463_v36, %v2263_v13  ;;  %v1453_v47 = vmul.f32 %v1452_v37, %v2263_v13  ;;  %vm1437_vm3 = vmor %vm1435_vm2, %vm1436_vm1  ;;  %v1734_v31 = vld [vmem:[%s2313_s12] ss:$0 sm:$0xff] }
 0x7b7   : > { %v1432_v18 = vsub.f32 1.0, %v1431_v34  ;;  %v1404_v43 = vmul.f32 %v1403_v35, %v1379_v28 }
 0x7b8   : > { %v1465_v46 = vadd.f32 0.112945676, %v1464_v42  ;;  %v1454_v56 = vadd.f32 0.05243302, %v1453_v47 }
 0x7b9   : > { %v1433_v44 = vmul.f32 %v1800_v30, %v1432_v18  ;;  %v1661_v63 = vclamps-f32 %v1404_v43, 1.0 }
 0x7ba   : > { %v1466_v50 = vmul.f32 %v1465_v46, %v2263_v13  ;;  %v1455_v6 = vmul.f32 %v1454_v56, %v2263_v13 }
 0x7bb   : > { %v1434_v32 = vadd.f32 %v1800_v30, %v1433_v44  ;;  %v1487_v58 = vadd.f32 1.0, %v1661_v63 }
 0x7bc   : > { %v1467_v53 = vadd.f32 0.4994258, %v1466_v50  ;;  %v1456_v9 = vadd.f32 0.18741608, %v1455_v6 }
 0x7bd   : > { %v1438_v49 = vsel %vm1437_vm3, %v1800_v30, %v1434_v32  ;;  %v1490_v11 = vmul.f32 %v1487_v58, %v1361_v1 }
 0x7be   : > { %v1443_v51 = vsel %vm1440_vm4, %v1442_v48, %v1438_v49  ;;  %v1468_v57 = vmul.f32 %v1467_v53, %v2263_v13  ;;  %v1457_v55 = vmul.f32 %v1456_v9, %v2263_v13  ;;  %v1363_v13 = vmul.f32 0.5, %v2254_v61 }
 0x7bf   : > { %v1444_v54 = vmul.f32 %v1443_v51, %v1419_v39 }
 0x7c0   : > { %v1469_v0 = vadd.f32 1.0, %v1468_v57  ;;  %v1458_v59 = vadd.f32 1.1283791, %v1457_v55 }
 0x7c1   : > { %v1662_v62 = vclamps-f32 %v1444_v54, 1.0 }
 0x7c2   : > { %1801 = vrcp.f32 %v1469_v0  ;;  %v1481_v60 = vand.u32 2147483648, %v1469_v0  ;;  %v1479_v24 = vand.u32 2147483647, %v1469_v0  ;;  %vm1475_vm7 = vweird.f32 %v1469_v0 }
 0x7c3   : > { %v1488_v4 = vadd.f32 1.0, %v1662_v62  ;;  %v1459_v21 = vmul.f32 %v1458_v59, %v2257_v40 }
 0x7c4   : > { %v1482_v17 = vor.u32 1.1754944e-38, %v1481_v60  ;;  %vm1480_vm9 = vcmp.eq.f32.partialorder %v1479_v24, 8.507059e+37 }
 0x7c5   : > { %v1491_v7 = vmul.f32 %v1488_v4, %v1362_v3 }
 0x7c7   : > { %v1493_v8 = vpack.c.bf16 %v1491_v7, %v1490_v11 }
 0x7c8   : > { %v1802_v52 = vpop.eup %1801 }
 0x7c9   : > { %1680 = vmatmul.msk.bf16.vlgmr.msra.gmra.mxu3 %vm1522_vm5, %v1493_v8  ;;  %v1471_v19 = vmul.f32 %v1802_v52, %v1469_v0  ;;  %vm1476_vm6 = vweird.f32 %v1802_v52 }
 0x7ca   : > { %vm1477_vm8 = vmor %vm1475_vm7, %vm1476_vm6 }
 0x7cb   : > { %v1472_v14 = vsub.f32 1.0, %v1471_v19 }
 0x7cd   : > { %v1473_v12 = vmul.f32 %v1802_v52, %v1472_v14 }
 0x7cf   : > { %v1474_v16 = vadd.f32 %v1802_v52, %v1473_v12 }
 0x7d1   : > { %v1478_v22 = vsel %vm1477_vm8, %v1802_v52, %v1474_v16 }
 0x7d2   : > { %v1483_v23 = vsel %vm1480_vm9, %v1482_v17, %v1478_v22 }
 0x7d3   : > { %v1484_v25 = vmul.f32 %v1483_v23, %v1459_v21 }
 0x7d5   : > { %v1663_v26 = vclamps-f32 %v1484_v25, 1.0 }
 0x7d7   : > { %v1489_v29 = vadd.f32 1.0, %v1663_v26 }
 0x7d9   : > { %v1492_v27 = vmul.f32 %v1489_v29, %v1363_v13 }
 0x7db   : > { %v1494_v30 = vpack.c.bf16 %v1492_v27, %v1492_v27 }
 0x7dd   : > { %1681 = vmatmul.msk.bf16.gmra.mxu3 %vm1522_vm5, %v1494_v30 }
 0x84c   : > { %v1538_v20 = vpop.f32.mrf.mxu3 }
 0x84d   : > { %v1539_v15 = vadd.f32 %v1734_v31, %v1538_v20 }
 0x84f   : > { %v1547_v40 = vadd.f32 %v1539_v15, %v2176_v5 }
 0x851   : > { %1550 = vst.msk [vmem:[%s440_s19] sm:$0xff] %vm473_vm0, %v1547_v40 }
 0x854   : > { %v1540_v61 = vpop.f32.mrf.mxu3 }
 0x855   : > { %v1541_v33 = vadd.f32 %v1734_v31, %v1540_v61 }
 0x857   : > { %v1548_v34 = vadd.f32 %v1541_v33, %v2181_v2 }
 0x859   : > { %1551 = vst.msk [vmem:[%s440_s19 + $0x8] sm:$0xff] %vm473_vm0, %v1548_v34 }
 0x860   : > { %v1543_v35 = vpop.f32.mrf.mxu3 }
 0x861   : > { %v1544_v36 = vadd.f32 %v1734_v31, %v1543_v35 }
 0x863   : > { %v1549_v28 = vadd.f32 %v1544_v36, %v2186_v10 }
 0x865   : > { %1552 = vst.msk [vmem:[%s440_s19 + $0x10] sm:$0xff] %vm473_vm0, %v1549_v28 }
 0x868   : > { %v1545_v18 = vpop.f32.mrf.mxu3 }
 0x869 PF: > { %s23_s25 = sadd.s32 1, %s1812_s25  }
 0x86a   : > { %p20_p4 = scmp.ge.s32.totalorder %s23_s25, 4  }
 0x86c   :  { %22 = sbr.rel (!%p20_p4) target bundleno = 1 (0x1), region = 102 }

</bundles_post_ra>
